<compile_context>
chip_gen: v7x
topology: tpu7x:2x2x1
jax: 0.10.0
libtpu: 0.0.40
codegen_flags: <defaults>
</compile_context>

<pallas_src>
import math
import jax
import jax.numpy as jnp
from jax.experimental import pallas as pl
from jax.experimental.pallas import tpu as pltpu

# ----- small, module-consistent config -----
B, S, D, H, DFF, N_LAYERS = 2, 8, 32, 4, 64, 2
DK = D // H
BS = B * S
EPS = 1e-6

# rows of the packed small-parameter slab (one (8,128) tile per layer)
ROW_BQKV, ROW_BO, ROW_L1A, ROW_L1B, ROW_L2A, ROW_L2B, ROW_B1, ROW_B2 = range(8)
SLAB_ROWS, SLAB_COLS = 8, 128


def _layernorm(x, a, b, eps=EPS):
    # matches torch LayerNorm in the module: mean, *unbiased* std, /(std+eps)
    mean = jnp.mean(x, axis=-1, keepdims=True)
    var = jnp.sum((x - mean) ** 2, axis=-1, keepdims=True) / (x.shape[-1] - 1)
    std = jnp.sqrt(var)
    return a * (x - mean) / (std + eps) + b


def encoder_kernel(x_ref, mask_ref, wqkv_ref, wo_ref, w1_ref, w2_ref, small_ref,
                   o_ref, attn_vmem):
    x = x_ref[...]                                   # (B*S, D)

    # --- additive attention mask: computed once for all layers & heads ---
    m = mask_ref[...]                                # (B, 1, S)
    neg = jnp.where(m == 0.0, -1e9, 0.0)             # masked_fill -> additive
    mask_full = jnp.broadcast_to(neg, (B, S, S))     # hoisted broadcast

    scale = 1.0 / math.sqrt(DK)

    for l in range(N_LAYERS):                        # static unroll (N_LAYERS=2)
        slab = small_ref[l]                          # (8, 128) packed params
        bqkv = slab[ROW_BQKV:ROW_BQKV + 1, :3 * D]   # (1, 3D)
        bo = slab[ROW_BO:ROW_BO + 1, :D]
        l1a = slab[ROW_L1A:ROW_L1A + 1, :D]
        l1b = slab[ROW_L1B:ROW_L1B + 1, :D]
        l2a = slab[ROW_L2A:ROW_L2A + 1, :D]
        l2b = slab[ROW_L2B:ROW_L2B + 1, :D]
        b1 = slab[ROW_B1:ROW_B1 + 1, :DFF]
        b2 = slab[ROW_B2:ROW_B2 + 1, :D]

        # --- sublayer 1: x + SelfAttn(LayerNorm(x)) ---
        xn = _layernorm(x, l1a, l1b)
        qkv = jnp.dot(xn, wqkv_ref[l],
                      preferred_element_type=jnp.float32) + bqkv   # (BS, 3D)
        q = qkv[:, :D] * scale        # fold 1/sqrt(dk) into q once
        k = qkv[:, D:2 * D]
        v = qkv[:, 2 * D:3 * D]

        # static head loop; each head's dots are batched over B on the MXU.
        # head outputs go into a VMEM scratch (no concatenate).
        for h in range(H):
            sl = slice(h * DK, (h + 1) * DK)
            qh = q[:, sl].reshape(B, S, DK)
            kh = k[:, sl].reshape(B, S, DK)
            vh = v[:, sl].reshape(B, S, DK)
            sc = jnp.einsum('bqd,bkd->bqk', qh, kh,
                            preferred_element_type=jnp.float32) + mask_full
            sc = sc - jnp.max(sc, axis=-1, keepdims=True)
            e = jnp.exp(sc)
            p = e * pl.reciprocal(jnp.sum(e, axis=-1, keepdims=True),
                                  approx=True)
            oh = jnp.einsum('bqk,bkd->bqd', p, vh,
                            preferred_element_type=jnp.float32)    # (B,S,DK)
            attn_vmem[:, sl] = oh.reshape(BS, DK)

        attn = attn_vmem[...]                                      # (BS, D)
        x = x + jnp.dot(attn, wo_ref[l],
                        preferred_element_type=jnp.float32) + bo

        # --- sublayer 2: x + FFN(LayerNorm(x)) ---
        xn2 = _layernorm(x, l2a, l2b)
        h1 = jnp.maximum(
            jnp.dot(xn2, w1_ref[l], preferred_element_type=jnp.float32) + b1,
            0.0)
        x = x + jnp.dot(h1, w2_ref[l],
                        preferred_element_type=jnp.float32) + b2

    # --- final LayerNorm (params packed into slot N_LAYERS of the slab) ---
    fin = small_ref[N_LAYERS]
    o_ref[...] = _layernorm(x, fin[0:1, :D], fin[1:2, :D])


def make_encoder_call():
    return pl.pallas_call(
        encoder_kernel,
        out_shape=jax.ShapeDtypeStruct((BS, D), jnp.float32),
        scratch_shapes=[pltpu.VMEM((BS, D), jnp.float32)],
    )


def pack_params(params):
    """Pack per-layer weights into stacked, layer-axis arrays + one small slab."""
    wqkv_l, wo_l, w1_l, w2_l, small_l = [], [], [], [], []
    for (wq, bq, wk, bk, wv, bv, wo, bo,
         l1a, l1b, l2a, l2b, w1, b1, w2, b2) in params["layers"]:
        wqkv_l.append(jnp.concatenate([wq, wk, wv], axis=1))        # (D, 3D)
        wo_l.append(wo)
        w1_l.append(w1)
        w2_l.append(w2)
        slab = jnp.zeros((SLAB_ROWS, SLAB_COLS), jnp.float32)
        slab = slab.at[ROW_BQKV, :3 * D].set(
            jnp.concatenate([bq, bk, bv], axis=1)[0])
        slab = slab.at[ROW_BO, :D].set(bo[0])
        slab = slab.at[ROW_L1A, :D].set(l1a[0])
        slab = slab.at[ROW_L1B, :D].set(l1b[0])
        slab = slab.at[ROW_L2A, :D].set(l2a[0])
        slab = slab.at[ROW_L2B, :D].set(l2b[0])
        slab = slab.at[ROW_B1, :DFF].set(b1[0])
        slab = slab.at[ROW_B2, :D].set(b2[0])
        small_l.append(slab)
    fin = jnp.zeros((SLAB_ROWS, SLAB_COLS), jnp.float32)
    fin = fin.at[0, :D].set(params["final_a"][0])
    fin = fin.at[1, :D].set(params["final_b"][0])
    small_l.append(fin)
    return (jnp.stack(wqkv_l), jnp.stack(wo_l), jnp.stack(w1_l),
            jnp.stack(w2_l), jnp.stack(small_l))


def encoder_pallas(x, mask, params):
    wqkv, wo, w1, w2, small = pack_params(params)
    out = make_encoder_call()(x.reshape(BS, D), mask, wqkv, wo, w1, w2, small)
    return out.reshape(B, S, D)


# ---------------- pure-JAX reference (for correctness check) ----------------
def _ref_ln(x, a, b):
    mean = x.mean(-1, keepdims=True)
    var = ((x - mean) ** 2).sum(-1, keepdims=True) / (x.shape[-1] - 1)
    return a * (x - mean) / (jnp.sqrt(var) + EPS) + b


def encoder_ref(x, mask, params):
    for (wq, bq, wk, bk, wv, bv, wo, bo,
         l1a, l1b, l2a, l2b, w1, b1, w2, b2) in params["layers"]:
        xn = _ref_ln(x, l1a, l1b)
        q = xn @ wq + bq
        k = xn @ wk + bk
        v = xn @ wv + bv
        qh = q.reshape(B, S, H, DK).transpose(0, 2, 1, 3)
        kh = k.reshape(B, S, H, DK).transpose(0, 2, 1, 3)
        vh = v.reshape(B, S, H, DK).transpose(0, 2, 1, 3)
        sc = jnp.einsum('bhqd,bhkd->bhqk', qh, kh) / math.sqrt(DK)
        sc = jnp.where(mask[:, None, :, :] == 0.0, -1e9, sc)
        p = jax.nn.softmax(sc, axis=-1)
        o = jnp.einsum('bhqk,bhkd->bhqd', p, vh).transpose(0, 2, 1, 3)
        o = o.reshape(B, S, D)
        x = x + (o @ wo + bo)
        xn2 = _ref_ln(x, l2a, l2b)
        x = x + (jnp.maximum(xn2 @ w1 + b1, 0.0) @ w2 + b2)
    return _ref_ln(x, params["final_a"], params["final_b"])


# ---------------- deterministic parameter construction ----------------
def init_params(key):
    layers = []
    for _ in range(N_LAYERS):
        ws = []
        for shape in [(D, D), (1, D), (D, D), (1, D), (D, D), (1, D),
                      (D, D), (1, D)]:
            key, sub = jax.random.split(key)
            ws.append(jax.random.normal(sub, shape, jnp.float32) * 0.05)
        # layernorm params: ones / zeros as in the module's __init__
        ws += [jnp.ones((1, D), jnp.float32), jnp.zeros((1, D), jnp.float32),
               jnp.ones((1, D), jnp.float32), jnp.zeros((1, D), jnp.float32)]
        for shape in [(D, DFF), (1, DFF), (DFF, D), (1, D)]:
            key, sub = jax.random.split(key)
            ws.append(jax.random.normal(sub, shape, jnp.float32) * 0.05)
        layers.append(tuple(ws))
    return {"layers": layers,
            "final_a": jnp.ones((1, D), jnp.float32),
            "final_b": jnp.zeros((1, D), jnp.float32)}, key


if __name__ == "__main__":
    key = jax.random.PRNGKey(0)
    params, key = init_params(key)
    key, kx = jax.random.split(key)
    x = jax.random.normal(kx, (B, S, D), jnp.float32)
    mask = jnp.ones((B, 1, S), jnp.float32)
    mask = mask.at[1, 0, S - 2:].set(0.0)   # mask out last 2 keys of batch 1

    out = encoder_pallas(x, mask, params)
    out = jax.block_until_ready(out)

    ref = encoder_ref(x, mask, params)
    assert out.shape == (B, S, D)
    # tolerance accounts for the approximate (EUP) softmax-denominator
    # reciprocal used in-kernel; everything else is exact f32.
    assert jnp.allclose(out, ref, atol=2e-3, rtol=2e-3), (
        float(jnp.max(jnp.abs(out - ref))))
    print("KERNEL_OK")
</pallas_src>

<mosaic_0001>
module attributes {stable_mosaic.version = 11 : i64} {
  func.func @encoder_kernel(%arg0: memref<16x32xf32, #tpu.memory_space<vmem>>, %arg1: memref<2x1x8xf32, #tpu.memory_space<vmem>>, %arg2: memref<2x32x96xf32, #tpu.memory_space<vmem>>, %arg3: memref<2x32x32xf32, #tpu.memory_space<vmem>>, %arg4: memref<2x32x64xf32, #tpu.memory_space<vmem>>, %arg5: memref<2x64x32xf32, #tpu.memory_space<vmem>>, %arg6: memref<3x8x128xf32, #tpu.memory_space<vmem>>, %arg7: memref<16x32xf32, #tpu.memory_space<vmem>>, %arg8: memref<16x32xf32, #tpu.memory_space<vmem>>) attributes {dimension_semantics = [], scalar_prefetch = 0 : i64, scratch_operands = 1 : i64, tpu.core_type = #tpu.core_type<tc>} {
    %c0 = arith.constant 0 : index
    %c0_0 = arith.constant 0 : index
    %0 = vector.load %arg0[%c0, %c0_0] : memref<16x32xf32, #tpu.memory_space<vmem>>, vector<16x32xf32>
    %c0_1 = arith.constant 0 : index
    %c0_2 = arith.constant 0 : index
    %c0_3 = arith.constant 0 : index
    %1 = vector.load %arg1[%c0_1, %c0_2, %c0_3] : memref<2x1x8xf32, #tpu.memory_space<vmem>>, vector<2x1x8xf32>
    %cst = arith.constant 0.000000e+00 : f32
    %2 = vector.broadcast %cst : f32 to vector<2x1x8xf32>
    %3 = arith.cmpf oeq, %1, %2 : vector<2x1x8xf32>
    %cst_4 = arith.constant -1.000000e+09 : f32
    %cst_5 = arith.constant 0.000000e+00 : f32
    %4 = vector.broadcast %cst_4 : f32 to vector<2x1x8xf32>
    %5 = vector.broadcast %cst_5 : f32 to vector<2x1x8xf32>
    %6 = arith.select %3, %4, %5 : vector<2x1x8xi1>, vector<2x1x8xf32>
    %7 = vector.shape_cast %6 : vector<2x1x8xf32> to vector<2x1x8xf32>
    %8 = vector.broadcast %7 : vector<2x1x8xf32> to vector<2x8x8xf32>
    %c0_6 = arith.constant 0 : index
    %c0_7 = arith.constant 0 : index
    %c0_8 = arith.constant 0 : index
    %9 = vector.load %arg6[%c0_6, %c0_7, %c0_8] : memref<3x8x128xf32, #tpu.memory_space<vmem>>, vector<1x8x128xf32>
    %10 = vector.shape_cast %9 : vector<1x8x128xf32> to vector<8x128xf32>
    %11 = vector.extract_strided_slice %10 {offsets = [0, 0], sizes = [1, 96], strides = [1, 1]} : vector<8x128xf32> to vector<1x96xf32>
    %12 = vector.extract_strided_slice %10 {offsets = [1, 0], sizes = [1, 32], strides = [1, 1]} : vector<8x128xf32> to vector<1x32xf32>
    %13 = vector.extract_strided_slice %10 {offsets = [2, 0], sizes = [1, 32], strides = [1, 1]} : vector<8x128xf32> to vector<1x32xf32>
    %14 = vector.extract_strided_slice %10 {offsets = [3, 0], sizes = [1, 32], strides = [1, 1]} : vector<8x128xf32> to vector<1x32xf32>
    %15 = vector.extract_strided_slice %10 {offsets = [4, 0], sizes = [1, 32], strides = [1, 1]} : vector<8x128xf32> to vector<1x32xf32>
    %16 = vector.extract_strided_slice %10 {offsets = [5, 0], sizes = [1, 32], strides = [1, 1]} : vector<8x128xf32> to vector<1x32xf32>
    %17 = vector.extract_strided_slice %10 {offsets = [6, 0], sizes = [1, 64], strides = [1, 1]} : vector<8x128xf32> to vector<1x64xf32>
    %18 = vector.extract_strided_slice %10 {offsets = [7, 0], sizes = [1, 32], strides = [1, 1]} : vector<8x128xf32> to vector<1x32xf32>
    %cst_9 = arith.constant dense<0.000000e+00> : vector<16xf32>
    %19 = vector.multi_reduction <add>, %0, %cst_9 [1] : vector<16x32xf32> to vector<16xf32>
    %20 = vector.shape_cast %19 : vector<16xf32> to vector<16x1xf32>
    %cst_10 = arith.constant 3.200000e+01 : f32
    %21 = vector.broadcast %cst_10 : f32 to vector<16x1xf32>
    %22 = arith.divf %20, %21 : vector<16x1xf32>
    %23 = vector.broadcast %22 : vector<16x1xf32> to vector<16x32xf32>
    %24 = arith.subf %0, %23 : vector<16x32xf32>
    %25 = arith.mulf %24, %24 : vector<16x32xf32>
    %cst_11 = arith.constant dense<0.000000e+00> : vector<16xf32>
    %26 = vector.multi_reduction <add>, %25, %cst_11 [1] : vector<16x32xf32> to vector<16xf32>
    %27 = vector.shape_cast %26 : vector<16xf32> to vector<16x1xf32>
    %cst_12 = arith.constant 3.100000e+01 : f32
    %28 = vector.broadcast %cst_12 : f32 to vector<16x1xf32>
    %29 = arith.divf %27, %28 : vector<16x1xf32>
    %30 = math.sqrt %29 : vector<16x1xf32>
    %31 = vector.broadcast %22 : vector<16x1xf32> to vector<16x32xf32>
    %32 = arith.subf %0, %31 : vector<16x32xf32>
    %33 = vector.broadcast %13 : vector<1x32xf32> to vector<16x32xf32>
    %34 = arith.mulf %33, %32 : vector<16x32xf32>
    %cst_13 = arith.constant 9.99999997E-7 : f32
    %35 = vector.broadcast %cst_13 : f32 to vector<16x1xf32>
    %36 = arith.addf %30, %35 : vector<16x1xf32>
    %37 = vector.broadcast %36 : vector<16x1xf32> to vector<16x32xf32>
    %38 = arith.divf %34, %37 : vector<16x32xf32>
    %39 = vector.broadcast %14 : vector<1x32xf32> to vector<16x32xf32>
    %40 = arith.addf %38, %39 : vector<16x32xf32>
    %c0_14 = arith.constant 0 : index
    %c0_15 = arith.constant 0 : index
    %c0_16 = arith.constant 0 : index
    %41 = vector.load %arg2[%c0_14, %c0_15, %c0_16] : memref<2x32x96xf32, #tpu.memory_space<vmem>>, vector<1x32x96xf32>
    %42 = vector.shape_cast %41 : vector<1x32x96xf32> to vector<32x96xf32>
    %cst_17 = arith.constant dense<0.000000e+00> : vector<16x96xf32>
    %43 = tpu.matmul %40, %42, %cst_17 {dimension_numbers = #tpu.dot_dimension_numbers<[1], [0], [0], [1], [0, 0, 1, 1], [], []>} : vector<16x32xf32>, vector<32x96xf32>, vector<16x96xf32> -> vector<16x96xf32>
    %44 = vector.broadcast %11 : vector<1x96xf32> to vector<16x96xf32>
    %45 = arith.addf %43, %44 : vector<16x96xf32>
    %46 = vector.extract_strided_slice %45 {offsets = [0, 0], sizes = [16, 32], strides = [1, 1]} : vector<16x96xf32> to vector<16x32xf32>
    %cst_18 = arith.constant 0.353553385 : f32
    %47 = vector.broadcast %cst_18 : f32 to vector<16x32xf32>
    %48 = arith.mulf %46, %47 : vector<16x32xf32>
    %49 = vector.extract_strided_slice %45 {offsets = [0, 32], sizes = [16, 32], strides = [1, 1]} : vector<16x96xf32> to vector<16x32xf32>
    %50 = vector.extract_strided_slice %45 {offsets = [0, 64], sizes = [16, 32], strides = [1, 1]} : vector<16x96xf32> to vector<16x32xf32>
    %51 = vector.extract_strided_slice %48 {offsets = [0, 0], sizes = [16, 8], strides = [1, 1]} : vector<16x32xf32> to vector<16x8xf32>
    %52 = vector.shape_cast %51 : vector<16x8xf32> to vector<2x8x8xf32>
    %53 = vector.extract_strided_slice %49 {offsets = [0, 0], sizes = [16, 8], strides = [1, 1]} : vector<16x32xf32> to vector<16x8xf32>
    %54 = vector.shape_cast %53 : vector<16x8xf32> to vector<2x8x8xf32>
    %55 = vector.extract_strided_slice %50 {offsets = [0, 0], sizes = [16, 8], strides = [1, 1]} : vector<16x32xf32> to vector<16x8xf32>
    %56 = vector.shape_cast %55 : vector<16x8xf32> to vector<2x8x8xf32>
    "tpu.trace_start"() <{level = 10 : i32, message = "bqd,bkd->bqk"}> : () -> ()
    %cst_19 = arith.constant dense<0.000000e+00> : vector<2x8x8xf32>
    %57 = tpu.matmul %52, %54, %cst_19 {dimension_numbers = #tpu.dot_dimension_numbers<[2], [2], [1], [1], [0, 0, 0, 1, 1, 1], [0], [0]>} : vector<2x8x8xf32>, vector<2x8x8xf32>, vector<2x8x8xf32> -> vector<2x8x8xf32>
    "tpu.trace_stop"() : () -> ()
    %58 = arith.addf %57, %8 : vector<2x8x8xf32>
    %cst_20 = arith.constant dense<0xFF800000> : vector<2x8xf32>
    %59 = vector.multi_reduction <maximumf>, %58, %cst_20 [2] : vector<2x8x8xf32> to vector<2x8xf32>
    %60 = vector.shape_cast %59 : vector<2x8xf32> to vector<2x8x1xf32>
    %61 = vector.broadcast %60 : vector<2x8x1xf32> to vector<2x8x8xf32>
    %62 = arith.subf %58, %61 : vector<2x8x8xf32>
    %63 = math.exp %62 : vector<2x8x8xf32>
    %cst_21 = arith.constant dense<0.000000e+00> : vector<2x8xf32>
    %64 = vector.multi_reduction <add>, %63, %cst_21 [2] : vector<2x8x8xf32> to vector<2x8xf32>
    %65 = vector.shape_cast %64 : vector<2x8xf32> to vector<2x8x1xf32>
    %66 = tpu.reciprocal %65 {approx = true} : vector<2x8x1xf32> -> vector<2x8x1xf32>
    %67 = vector.broadcast %66 : vector<2x8x1xf32> to vector<2x8x8xf32>
    %68 = arith.mulf %63, %67 : vector<2x8x8xf32>
    "tpu.trace_start"() <{level = 10 : i32, message = "bqk,bkd->bqd"}> : () -> ()
    %cst_22 = arith.constant dense<0.000000e+00> : vector<2x8x8xf32>
    %69 = tpu.matmul %68, %56, %cst_22 {dimension_numbers = #tpu.dot_dimension_numbers<[2], [1], [1], [2], [0, 0, 0, 1, 1, 2], [0], [0]>} : vector<2x8x8xf32>, vector<2x8x8xf32>, vector<2x8x8xf32> -> vector<2x8x8xf32>
    "tpu.trace_stop"() : () -> ()
    %70 = vector.shape_cast %69 : vector<2x8x8xf32> to vector<16x8xf32>
    %c0_23 = arith.constant 0 : index
    %c0_24 = arith.constant 0 : index
    %71 = vector.load %arg8[%c0_23, %c0_24] : memref<16x32xf32, #tpu.memory_space<vmem>>, vector<16x8xf32>
    tpu.vector_store %arg8[%c0_23, %c0_24], %70 {strides = array<i32>} : memref<16x32xf32, #tpu.memory_space<vmem>>, vector<16x8xf32>,
    %72 = vector.extract_strided_slice %48 {offsets = [0, 8], sizes = [16, 8], strides = [1, 1]} : vector<16x32xf32> to vector<16x8xf32>
    %73 = vector.shape_cast %72 : vector<16x8xf32> to vector<2x8x8xf32>
    %74 = vector.extract_strided_slice %49 {offsets = [0, 8], sizes = [16, 8], strides = [1, 1]} : vector<16x32xf32> to vector<16x8xf32>
    %75 = vector.shape_cast %74 : vector<16x8xf32> to vector<2x8x8xf32>
    %76 = vector.extract_strided_slice %50 {offsets = [0, 8], sizes = [16, 8], strides = [1, 1]} : vector<16x32xf32> to vector<16x8xf32>
    %77 = vector.shape_cast %76 : vector<16x8xf32> to vector<2x8x8xf32>
    "tpu.trace_start"() <{level = 10 : i32, message = "bqd,bkd->bqk"}> : () -> ()
    %cst_25 = arith.constant dense<0.000000e+00> : vector<2x8x8xf32>
    %78 = tpu.matmul %73, %75, %cst_25 {dimension_numbers = #tpu.dot_dimension_numbers<[2], [2], [1], [1], [0, 0, 0, 1, 1, 1], [0], [0]>} : vector<2x8x8xf32>, vector<2x8x8xf32>, vector<2x8x8xf32> -> vector<2x8x8xf32>
    "tpu.trace_stop"() : () -> ()
    %79 = arith.addf %78, %8 : vector<2x8x8xf32>
    %cst_26 = arith.constant dense<0xFF800000> : vector<2x8xf32>
    %80 = vector.multi_reduction <maximumf>, %79, %cst_26 [2] : vector<2x8x8xf32> to vector<2x8xf32>
    %81 = vector.shape_cast %80 : vector<2x8xf32> to vector<2x8x1xf32>
    %82 = vector.broadcast %81 : vector<2x8x1xf32> to vector<2x8x8xf32>
    %83 = arith.subf %79, %82 : vector<2x8x8xf32>
    %84 = math.exp %83 : vector<2x8x8xf32>
    %cst_27 = arith.constant dense<0.000000e+00> : vector<2x8xf32>
    %85 = vector.multi_reduction <add>, %84, %cst_27 [2] : vector<2x8x8xf32> to vector<2x8xf32>
    %86 = vector.shape_cast %85 : vector<2x8xf32> to vector<2x8x1xf32>
    %87 = tpu.reciprocal %86 {approx = true} : vector<2x8x1xf32> -> vector<2x8x1xf32>
    %88 = vector.broadcast %87 : vector<2x8x1xf32> to vector<2x8x8xf32>
    %89 = arith.mulf %84, %88 : vector<2x8x8xf32>
    "tpu.trace_start"() <{level = 10 : i32, message = "bqk,bkd->bqd"}> : () -> ()
    %cst_28 = arith.constant dense<0.000000e+00> : vector<2x8x8xf32>
    %90 = tpu.matmul %89, %77, %cst_28 {dimension_numbers = #tpu.dot_dimension_numbers<[2], [1], [1], [2], [0, 0, 0, 1, 1, 2], [0], [0]>} : vector<2x8x8xf32>, vector<2x8x8xf32>, vector<2x8x8xf32> -> vector<2x8x8xf32>
    "tpu.trace_stop"() : () -> ()
    %91 = vector.shape_cast %90 : vector<2x8x8xf32> to vector<16x8xf32>
    %c0_29 = arith.constant 0 : index
    %c8 = arith.constant 8 : index
    %92 = vector.load %arg8[%c0_29, %c8] : memref<16x32xf32, #tpu.memory_space<vmem>>, vector<16x8xf32>
    tpu.vector_store %arg8[%c0_29, %c8], %91 {strides = array<i32>} : memref<16x32xf32, #tpu.memory_space<vmem>>, vector<16x8xf32>,
    %93 = vector.extract_strided_slice %48 {offsets = [0, 16], sizes = [16, 8], strides = [1, 1]} : vector<16x32xf32> to vector<16x8xf32>
    %94 = vector.shape_cast %93 : vector<16x8xf32> to vector<2x8x8xf32>
    %95 = vector.extract_strided_slice %49 {offsets = [0, 16], sizes = [16, 8], strides = [1, 1]} : vector<16x32xf32> to vector<16x8xf32>
    %96 = vector.shape_cast %95 : vector<16x8xf32> to vector<2x8x8xf32>
    %97 = vector.extract_strided_slice %50 {offsets = [0, 16], sizes = [16, 8], strides = [1, 1]} : vector<16x32xf32> to vector<16x8xf32>
    %98 = vector.shape_cast %97 : vector<16x8xf32> to vector<2x8x8xf32>
    "tpu.trace_start"() <{level = 10 : i32, message = "bqd,bkd->bqk"}> : () -> ()
    %cst_30 = arith.constant dense<0.000000e+00> : vector<2x8x8xf32>
    %99 = tpu.matmul %94, %96, %cst_30 {dimension_numbers = #tpu.dot_dimension_numbers<[2], [2], [1], [1], [0, 0, 0, 1, 1, 1], [0], [0]>} : vector<2x8x8xf32>, vector<2x8x8xf32>, vector<2x8x8xf32> -> vector<2x8x8xf32>
    "tpu.trace_stop"() : () -> ()
    %100 = arith.addf %99, %8 : vector<2x8x8xf32>
    %cst_31 = arith.constant dense<0xFF800000> : vector<2x8xf32>
    %101 = vector.multi_reduction <maximumf>, %100, %cst_31 [2] : vector<2x8x8xf32> to vector<2x8xf32>
    %102 = vector.shape_cast %101 : vector<2x8xf32> to vector<2x8x1xf32>
    %103 = vector.broadcast %102 : vector<2x8x1xf32> to vector<2x8x8xf32>
    %104 = arith.subf %100, %103 : vector<2x8x8xf32>
    %105 = math.exp %104 : vector<2x8x8xf32>
    %cst_32 = arith.constant dense<0.000000e+00> : vector<2x8xf32>
    %106 = vector.multi_reduction <add>, %105, %cst_32 [2] : vector<2x8x8xf32> to vector<2x8xf32>
    %107 = vector.shape_cast %106 : vector<2x8xf32> to vector<2x8x1xf32>
    %108 = tpu.reciprocal %107 {approx = true} : vector<2x8x1xf32> -> vector<2x8x1xf32>
    %109 = vector.broadcast %108 : vector<2x8x1xf32> to vector<2x8x8xf32>
    %110 = arith.mulf %105, %109 : vector<2x8x8xf32>
    "tpu.trace_start"() <{level = 10 : i32, message = "bqk,bkd->bqd"}> : () -> ()
    %cst_33 = arith.constant dense<0.000000e+00> : vector<2x8x8xf32>
    %111 = tpu.matmul %110, %98, %cst_33 {dimension_numbers = #tpu.dot_dimension_numbers<[2], [1], [1], [2], [0, 0, 0, 1, 1, 2], [0], [0]>} : vector<2x8x8xf32>, vector<2x8x8xf32>, vector<2x8x8xf32> -> vector<2x8x8xf32>
    "tpu.trace_stop"() : () -> ()
    %112 = vector.shape_cast %111 : vector<2x8x8xf32> to vector<16x8xf32>
    %c0_34 = arith.constant 0 : index
    %c16 = arith.constant 16 : index
    %113 = vector.load %arg8[%c0_34, %c16] : memref<16x32xf32, #tpu.memory_space<vmem>>, vector<16x8xf32>
    tpu.vector_store %arg8[%c0_34, %c16], %112 {strides = array<i32>} : memref<16x32xf32, #tpu.memory_space<vmem>>, vector<16x8xf32>,
    %114 = vector.extract_strided_slice %48 {offsets = [0, 24], sizes = [16, 8], strides = [1, 1]} : vector<16x32xf32> to vector<16x8xf32>
    %115 = vector.shape_cast %114 : vector<16x8xf32> to vector<2x8x8xf32>
    %116 = vector.extract_strided_slice %49 {offsets = [0, 24], sizes = [16, 8], strides = [1, 1]} : vector<16x32xf32> to vector<16x8xf32>
    %117 = vector.shape_cast %116 : vector<16x8xf32> to vector<2x8x8xf32>
    %118 = vector.extract_strided_slice %50 {offsets = [0, 24], sizes = [16, 8], strides = [1, 1]} : vector<16x32xf32> to vector<16x8xf32>
    %119 = vector.shape_cast %118 : vector<16x8xf32> to vector<2x8x8xf32>
    "tpu.trace_start"() <{level = 10 : i32, message = "bqd,bkd->bqk"}> : () -> ()
    %cst_35 = arith.constant dense<0.000000e+00> : vector<2x8x8xf32>
    %120 = tpu.matmul %115, %117, %cst_35 {dimension_numbers = #tpu.dot_dimension_numbers<[2], [2], [1], [1], [0, 0, 0, 1, 1, 1], [0], [0]>} : vector<2x8x8xf32>, vector<2x8x8xf32>, vector<2x8x8xf32> -> vector<2x8x8xf32>
    "tpu.trace_stop"() : () -> ()
    %121 = arith.addf %120, %8 : vector<2x8x8xf32>
    %cst_36 = arith.constant dense<0xFF800000> : vector<2x8xf32>
    %122 = vector.multi_reduction <maximumf>, %121, %cst_36 [2] : vector<2x8x8xf32> to vector<2x8xf32>
    %123 = vector.shape_cast %122 : vector<2x8xf32> to vector<2x8x1xf32>
    %124 = vector.broadcast %123 : vector<2x8x1xf32> to vector<2x8x8xf32>
    %125 = arith.subf %121, %124 : vector<2x8x8xf32>
    %126 = math.exp %125 : vector<2x8x8xf32>
    %cst_37 = arith.constant dense<0.000000e+00> : vector<2x8xf32>
    %127 = vector.multi_reduction <add>, %126, %cst_37 [2] : vector<2x8x8xf32> to vector<2x8xf32>
    %128 = vector.shape_cast %127 : vector<2x8xf32> to vector<2x8x1xf32>
    %129 = tpu.reciprocal %128 {approx = true} : vector<2x8x1xf32> -> vector<2x8x1xf32>
    %130 = vector.broadcast %129 : vector<2x8x1xf32> to vector<2x8x8xf32>
    %131 = arith.mulf %126, %130 : vector<2x8x8xf32>
    "tpu.trace_start"() <{level = 10 : i32, message = "bqk,bkd->bqd"}> : () -> ()
    %cst_38 = arith.constant dense<0.000000e+00> : vector<2x8x8xf32>
    %132 = tpu.matmul %131, %119, %cst_38 {dimension_numbers = #tpu.dot_dimension_numbers<[2], [1], [1], [2], [0, 0, 0, 1, 1, 2], [0], [0]>} : vector<2x8x8xf32>, vector<2x8x8xf32>, vector<2x8x8xf32> -> vector<2x8x8xf32>
    "tpu.trace_stop"() : () -> ()
    %133 = vector.shape_cast %132 : vector<2x8x8xf32> to vector<16x8xf32>
    %c0_39 = arith.constant 0 : index
    %c24 = arith.constant 24 : index
    %134 = vector.load %arg8[%c0_39, %c24] : memref<16x32xf32, #tpu.memory_space<vmem>>, vector<16x8xf32>
    tpu.vector_store %arg8[%c0_39, %c24], %133 {strides = array<i32>} : memref<16x32xf32, #tpu.memory_space<vmem>>, vector<16x8xf32>,
    %c0_40 = arith.constant 0 : index
    %c0_41 = arith.constant 0 : index
    %135 = vector.load %arg8[%c0_40, %c0_41] : memref<16x32xf32, #tpu.memory_space<vmem>>, vector<16x32xf32>
    %c0_42 = arith.constant 0 : index
    %c0_43 = arith.constant 0 : index
    %c0_44 = arith.constant 0 : index
    %136 = vector.load %arg3[%c0_42, %c0_43, %c0_44] : memref<2x32x32xf32, #tpu.memory_space<vmem>>, vector<1x32x32xf32>
    %137 = vector.shape_cast %136 : vector<1x32x32xf32> to vector<32x32xf32>
    %cst_45 = arith.constant dense<0.000000e+00> : vector<16x32xf32>
    %138 = tpu.matmul %135, %137, %cst_45 {dimension_numbers = #tpu.dot_dimension_numbers<[1], [0], [0], [1], [0, 0, 1, 1], [], []>} : vector<16x32xf32>, vector<32x32xf32>, vector<16x32xf32> -> vector<16x32xf32>
    %139 = arith.addf %0, %138 : vector<16x32xf32>
    %140 = vector.broadcast %12 : vector<1x32xf32> to vector<16x32xf32>
    %141 = arith.addf %139, %140 : vector<16x32xf32>
    %cst_46 = arith.constant dense<0.000000e+00> : vector<16xf32>
    %142 = vector.multi_reduction <add>, %141, %cst_46 [1] : vector<16x32xf32> to vector<16xf32>
    %143 = vector.shape_cast %142 : vector<16xf32> to vector<16x1xf32>
    %cst_47 = arith.constant 3.200000e+01 : f32
    %144 = vector.broadcast %cst_47 : f32 to vector<16x1xf32>
    %145 = arith.divf %143, %144 : vector<16x1xf32>
    %146 = vector.broadcast %145 : vector<16x1xf32> to vector<16x32xf32>
    %147 = arith.subf %141, %146 : vector<16x32xf32>
    %148 = arith.mulf %147, %147 : vector<16x32xf32>
    %cst_48 = arith.constant dense<0.000000e+00> : vector<16xf32>
    %149 = vector.multi_reduction <add>, %148, %cst_48 [1] : vector<16x32xf32> to vector<16xf32>
    %150 = vector.shape_cast %149 : vector<16xf32> to vector<16x1xf32>
    %cst_49 = arith.constant 3.100000e+01 : f32
    %151 = vector.broadcast %cst_49 : f32 to vector<16x1xf32>
    %152 = arith.divf %150, %151 : vector<16x1xf32>
    %153 = math.sqrt %152 : vector<16x1xf32>
    %154 = vector.broadcast %145 : vector<16x1xf32> to vector<16x32xf32>
    %155 = arith.subf %141, %154 : vector<16x32xf32>
    %156 = vector.broadcast %15 : vector<1x32xf32> to vector<16x32xf32>
    %157 = arith.mulf %156, %155 : vector<16x32xf32>
    %cst_50 = arith.constant 9.99999997E-7 : f32
    %158 = vector.broadcast %cst_50 : f32 to vector<16x1xf32>
    %159 = arith.addf %153, %158 : vector<16x1xf32>
    %160 = vector.broadcast %159 : vector<16x1xf32> to vector<16x32xf32>
    %161 = arith.divf %157, %160 : vector<16x32xf32>
    %162 = vector.broadcast %16 : vector<1x32xf32> to vector<16x32xf32>
    %163 = arith.addf %161, %162 : vector<16x32xf32>
    %c0_51 = arith.constant 0 : index
    %c0_52 = arith.constant 0 : index
    %c0_53 = arith.constant 0 : index
    %164 = vector.load %arg4[%c0_51, %c0_52, %c0_53] : memref<2x32x64xf32, #tpu.memory_space<vmem>>, vector<1x32x64xf32>
    %165 = vector.shape_cast %164 : vector<1x32x64xf32> to vector<32x64xf32>
    %cst_54 = arith.constant dense<0.000000e+00> : vector<16x64xf32>
    %166 = tpu.matmul %163, %165, %cst_54 {dimension_numbers = #tpu.dot_dimension_numbers<[1], [0], [0], [1], [0, 0, 1, 1], [], []>} : vector<16x32xf32>, vector<32x64xf32>, vector<16x64xf32> -> vector<16x64xf32>
    %167 = vector.broadcast %17 : vector<1x64xf32> to vector<16x64xf32>
    %168 = arith.addf %166, %167 : vector<16x64xf32>
    %cst_55 = arith.constant 0.000000e+00 : f32
    %169 = vector.broadcast %cst_55 : f32 to vector<16x64xf32>
    %170 = arith.maximumf %168, %169 : vector<16x64xf32>
    %c0_56 = arith.constant 0 : index
    %c0_57 = arith.constant 0 : index
    %c0_58 = arith.constant 0 : index
    %171 = vector.load %arg5[%c0_56, %c0_57, %c0_58] : memref<2x64x32xf32, #tpu.memory_space<vmem>>, vector<1x64x32xf32>
    %172 = vector.shape_cast %171 : vector<1x64x32xf32> to vector<64x32xf32>
    %cst_59 = arith.constant dense<0.000000e+00> : vector<16x32xf32>
    %173 = tpu.matmul %170, %172, %cst_59 {dimension_numbers = #tpu.dot_dimension_numbers<[1], [0], [0], [1], [0, 0, 1, 1], [], []>} : vector<16x64xf32>, vector<64x32xf32>, vector<16x32xf32> -> vector<16x32xf32>
    %174 = arith.addf %141, %173 : vector<16x32xf32>
    %175 = vector.broadcast %18 : vector<1x32xf32> to vector<16x32xf32>
    %176 = arith.addf %174, %175 : vector<16x32xf32>
    %c1 = arith.constant 1 : index
    %c0_60 = arith.constant 0 : index
    %c0_61 = arith.constant 0 : index
    %177 = vector.load %arg6[%c1, %c0_60, %c0_61] : memref<3x8x128xf32, #tpu.memory_space<vmem>>, vector<1x8x128xf32>
    %178 = vector.shape_cast %177 : vector<1x8x128xf32> to vector<8x128xf32>
    %179 = vector.extract_strided_slice %178 {offsets = [0, 0], sizes = [1, 96], strides = [1, 1]} : vector<8x128xf32> to vector<1x96xf32>
    %180 = vector.extract_strided_slice %178 {offsets = [1, 0], sizes = [1, 32], strides = [1, 1]} : vector<8x128xf32> to vector<1x32xf32>
    %181 = vector.extract_strided_slice %178 {offsets = [2, 0], sizes = [1, 32], strides = [1, 1]} : vector<8x128xf32> to vector<1x32xf32>
    %182 = vector.extract_strided_slice %178 {offsets = [3, 0], sizes = [1, 32], strides = [1, 1]} : vector<8x128xf32> to vector<1x32xf32>
    %183 = vector.extract_strided_slice %178 {offsets = [4, 0], sizes = [1, 32], strides = [1, 1]} : vector<8x128xf32> to vector<1x32xf32>
    %184 = vector.extract_strided_slice %178 {offsets = [5, 0], sizes = [1, 32], strides = [1, 1]} : vector<8x128xf32> to vector<1x32xf32>
    %185 = vector.extract_strided_slice %178 {offsets = [6, 0], sizes = [1, 64], strides = [1, 1]} : vector<8x128xf32> to vector<1x64xf32>
    %186 = vector.extract_strided_slice %178 {offsets = [7, 0], sizes = [1, 32], strides = [1, 1]} : vector<8x128xf32> to vector<1x32xf32>
    %cst_62 = arith.constant dense<0.000000e+00> : vector<16xf32>
    %187 = vector.multi_reduction <add>, %176, %cst_62 [1] : vector<16x32xf32> to vector<16xf32>
    %188 = vector.shape_cast %187 : vector<16xf32> to vector<16x1xf32>
    %cst_63 = arith.constant 3.200000e+01 : f32
    %189 = vector.broadcast %cst_63 : f32 to vector<16x1xf32>
    %190 = arith.divf %188, %189 : vector<16x1xf32>
    %191 = vector.broadcast %190 : vector<16x1xf32> to vector<16x32xf32>
    %192 = arith.subf %176, %191 : vector<16x32xf32>
    %193 = arith.mulf %192, %192 : vector<16x32xf32>
    %cst_64 = arith.constant dense<0.000000e+00> : vector<16xf32>
    %194 = vector.multi_reduction <add>, %193, %cst_64 [1] : vector<16x32xf32> to vector<16xf32>
    %195 = vector.shape_cast %194 : vector<16xf32> to vector<16x1xf32>
    %cst_65 = arith.constant 3.100000e+01 : f32
    %196 = vector.broadcast %cst_65 : f32 to vector<16x1xf32>
    %197 = arith.divf %195, %196 : vector<16x1xf32>
    %198 = math.sqrt %197 : vector<16x1xf32>
    %199 = vector.broadcast %190 : vector<16x1xf32> to vector<16x32xf32>
    %200 = arith.subf %176, %199 : vector<16x32xf32>
    %201 = vector.broadcast %181 : vector<1x32xf32> to vector<16x32xf32>
    %202 = arith.mulf %201, %200 : vector<16x32xf32>
    %cst_66 = arith.constant 9.99999997E-7 : f32
    %203 = vector.broadcast %cst_66 : f32 to vector<16x1xf32>
    %204 = arith.addf %198, %203 : vector<16x1xf32>
    %205 = vector.broadcast %204 : vector<16x1xf32> to vector<16x32xf32>
    %206 = arith.divf %202, %205 : vector<16x32xf32>
    %207 = vector.broadcast %182 : vector<1x32xf32> to vector<16x32xf32>
    %208 = arith.addf %206, %207 : vector<16x32xf32>
    %c1_67 = arith.constant 1 : index
    %c0_68 = arith.constant 0 : index
    %c0_69 = arith.constant 0 : index
    %209 = vector.load %arg2[%c1_67, %c0_68, %c0_69] : memref<2x32x96xf32, #tpu.memory_space<vmem>>, vector<1x32x96xf32>
    %210 = vector.shape_cast %209 : vector<1x32x96xf32> to vector<32x96xf32>
    %cst_70 = arith.constant dense<0.000000e+00> : vector<16x96xf32>
    %211 = tpu.matmul %208, %210, %cst_70 {dimension_numbers = #tpu.dot_dimension_numbers<[1], [0], [0], [1], [0, 0, 1, 1], [], []>} : vector<16x32xf32>, vector<32x96xf32>, vector<16x96xf32> -> vector<16x96xf32>
    %212 = vector.broadcast %179 : vector<1x96xf32> to vector<16x96xf32>
    %213 = arith.addf %211, %212 : vector<16x96xf32>
    %214 = vector.extract_strided_slice %213 {offsets = [0, 0], sizes = [16, 32], strides = [1, 1]} : vector<16x96xf32> to vector<16x32xf32>
    %cst_71 = arith.constant 0.353553385 : f32
    %215 = vector.broadcast %cst_71 : f32 to vector<16x32xf32>
    %216 = arith.mulf %214, %215 : vector<16x32xf32>
    %217 = vector.extract_strided_slice %213 {offsets = [0, 32], sizes = [16, 32], strides = [1, 1]} : vector<16x96xf32> to vector<16x32xf32>
    %218 = vector.extract_strided_slice %213 {offsets = [0, 64], sizes = [16, 32], strides = [1, 1]} : vector<16x96xf32> to vector<16x32xf32>
    %219 = vector.extract_strided_slice %216 {offsets = [0, 0], sizes = [16, 8], strides = [1, 1]} : vector<16x32xf32> to vector<16x8xf32>
    %220 = vector.shape_cast %219 : vector<16x8xf32> to vector<2x8x8xf32>
    %221 = vector.extract_strided_slice %217 {offsets = [0, 0], sizes = [16, 8], strides = [1, 1]} : vector<16x32xf32> to vector<16x8xf32>
    %222 = vector.shape_cast %221 : vector<16x8xf32> to vector<2x8x8xf32>
    %223 = vector.extract_strided_slice %218 {offsets = [0, 0], sizes = [16, 8], strides = [1, 1]} : vector<16x32xf32> to vector<16x8xf32>
    %224 = vector.shape_cast %223 : vector<16x8xf32> to vector<2x8x8xf32>
    "tpu.trace_start"() <{level = 10 : i32, message = "bqd,bkd->bqk"}> : () -> ()
    %cst_72 = arith.constant dense<0.000000e+00> : vector<2x8x8xf32>
    %225 = tpu.matmul %220, %222, %cst_72 {dimension_numbers = #tpu.dot_dimension_numbers<[2], [2], [1], [1], [0, 0, 0, 1, 1, 1], [0], [0]>} : vector<2x8x8xf32>, vector<2x8x8xf32>, vector<2x8x8xf32> -> vector<2x8x8xf32>
    "tpu.trace_stop"() : () -> ()
    %226 = arith.addf %225, %8 : vector<2x8x8xf32>
    %cst_73 = arith.constant dense<0xFF800000> : vector<2x8xf32>
    %227 = vector.multi_reduction <maximumf>, %226, %cst_73 [2] : vector<2x8x8xf32> to vector<2x8xf32>
    %228 = vector.shape_cast %227 : vector<2x8xf32> to vector<2x8x1xf32>
    %229 = vector.broadcast %228 : vector<2x8x1xf32> to vector<2x8x8xf32>
    %230 = arith.subf %226, %229 : vector<2x8x8xf32>
    %231 = math.exp %230 : vector<2x8x8xf32>
    %cst_74 = arith.constant dense<0.000000e+00> : vector<2x8xf32>
    %232 = vector.multi_reduction <add>, %231, %cst_74 [2] : vector<2x8x8xf32> to vector<2x8xf32>
    %233 = vector.shape_cast %232 : vector<2x8xf32> to vector<2x8x1xf32>
    %234 = tpu.reciprocal %233 {approx = true} : vector<2x8x1xf32> -> vector<2x8x1xf32>
    %235 = vector.broadcast %234 : vector<2x8x1xf32> to vector<2x8x8xf32>
    %236 = arith.mulf %231, %235 : vector<2x8x8xf32>
    "tpu.trace_start"() <{level = 10 : i32, message = "bqk,bkd->bqd"}> : () -> ()
    %cst_75 = arith.constant dense<0.000000e+00> : vector<2x8x8xf32>
    %237 = tpu.matmul %236, %224, %cst_75 {dimension_numbers = #tpu.dot_dimension_numbers<[2], [1], [1], [2], [0, 0, 0, 1, 1, 2], [0], [0]>} : vector<2x8x8xf32>, vector<2x8x8xf32>, vector<2x8x8xf32> -> vector<2x8x8xf32>
    "tpu.trace_stop"() : () -> ()
    %238 = vector.shape_cast %237 : vector<2x8x8xf32> to vector<16x8xf32>
    %c0_76 = arith.constant 0 : index
    %c0_77 = arith.constant 0 : index
    %239 = vector.load %arg8[%c0_76, %c0_77] : memref<16x32xf32, #tpu.memory_space<vmem>>, vector<16x8xf32>
    tpu.vector_store %arg8[%c0_76, %c0_77], %238 {strides = array<i32>} : memref<16x32xf32, #tpu.memory_space<vmem>>, vector<16x8xf32>,
    %240 = vector.extract_strided_slice %216 {offsets = [0, 8], sizes = [16, 8], strides = [1, 1]} : vector<16x32xf32> to vector<16x8xf32>
    %241 = vector.shape_cast %240 : vector<16x8xf32> to vector<2x8x8xf32>
    %242 = vector.extract_strided_slice %217 {offsets = [0, 8], sizes = [16, 8], strides = [1, 1]} : vector<16x32xf32> to vector<16x8xf32>
    %243 = vector.shape_cast %242 : vector<16x8xf32> to vector<2x8x8xf32>
    %244 = vector.extract_strided_slice %218 {offsets = [0, 8], sizes = [16, 8], strides = [1, 1]} : vector<16x32xf32> to vector<16x8xf32>
    %245 = vector.shape_cast %244 : vector<16x8xf32> to vector<2x8x8xf32>
    "tpu.trace_start"() <{level = 10 : i32, message = "bqd,bkd->bqk"}> : () -> ()
    %cst_78 = arith.constant dense<0.000000e+00> : vector<2x8x8xf32>
    %246 = tpu.matmul %241, %243, %cst_78 {dimension_numbers = #tpu.dot_dimension_numbers<[2], [2], [1], [1], [0, 0, 0, 1, 1, 1], [0], [0]>} : vector<2x8x8xf32>, vector<2x8x8xf32>, vector<2x8x8xf32> -> vector<2x8x8xf32>
    "tpu.trace_stop"() : () -> ()
    %247 = arith.addf %246, %8 : vector<2x8x8xf32>
    %cst_79 = arith.constant dense<0xFF800000> : vector<2x8xf32>
    %248 = vector.multi_reduction <maximumf>, %247, %cst_79 [2] : vector<2x8x8xf32> to vector<2x8xf32>
    %249 = vector.shape_cast %248 : vector<2x8xf32> to vector<2x8x1xf32>
    %250 = vector.broadcast %249 : vector<2x8x1xf32> to vector<2x8x8xf32>
    %251 = arith.subf %247, %250 : vector<2x8x8xf32>
    %252 = math.exp %251 : vector<2x8x8xf32>
    %cst_80 = arith.constant dense<0.000000e+00> : vector<2x8xf32>
    %253 = vector.multi_reduction <add>, %252, %cst_80 [2] : vector<2x8x8xf32> to vector<2x8xf32>
    %254 = vector.shape_cast %253 : vector<2x8xf32> to vector<2x8x1xf32>
    %255 = tpu.reciprocal %254 {approx = true} : vector<2x8x1xf32> -> vector<2x8x1xf32>
    %256 = vector.broadcast %255 : vector<2x8x1xf32> to vector<2x8x8xf32>
    %257 = arith.mulf %252, %256 : vector<2x8x8xf32>
    "tpu.trace_start"() <{level = 10 : i32, message = "bqk,bkd->bqd"}> : () -> ()
    %cst_81 = arith.constant dense<0.000000e+00> : vector<2x8x8xf32>
    %258 = tpu.matmul %257, %245, %cst_81 {dimension_numbers = #tpu.dot_dimension_numbers<[2], [1], [1], [2], [0, 0, 0, 1, 1, 2], [0], [0]>} : vector<2x8x8xf32>, vector<2x8x8xf32>, vector<2x8x8xf32> -> vector<2x8x8xf32>
    "tpu.trace_stop"() : () -> ()
    %259 = vector.shape_cast %258 : vector<2x8x8xf32> to vector<16x8xf32>
    %c0_82 = arith.constant 0 : index
    %c8_83 = arith.constant 8 : index
    %260 = vector.load %arg8[%c0_82, %c8_83] : memref<16x32xf32, #tpu.memory_space<vmem>>, vector<16x8xf32>
    tpu.vector_store %arg8[%c0_82, %c8_83], %259 {strides = array<i32>} : memref<16x32xf32, #tpu.memory_space<vmem>>, vector<16x8xf32>,
    %261 = vector.extract_strided_slice %216 {offsets = [0, 16], sizes = [16, 8], strides = [1, 1]} : vector<16x32xf32> to vector<16x8xf32>
    %262 = vector.shape_cast %261 : vector<16x8xf32> to vector<2x8x8xf32>
    %263 = vector.extract_strided_slice %217 {offsets = [0, 16], sizes = [16, 8], strides = [1, 1]} : vector<16x32xf32> to vector<16x8xf32>
    %264 = vector.shape_cast %263 : vector<16x8xf32> to vector<2x8x8xf32>
    %265 = vector.extract_strided_slice %218 {offsets = [0, 16], sizes = [16, 8], strides = [1, 1]} : vector<16x32xf32> to vector<16x8xf32>
    %266 = vector.shape_cast %265 : vector<16x8xf32> to vector<2x8x8xf32>
    "tpu.trace_start"() <{level = 10 : i32, message = "bqd,bkd->bqk"}> : () -> ()
    %cst_84 = arith.constant dense<0.000000e+00> : vector<2x8x8xf32>
    %267 = tpu.matmul %262, %264, %cst_84 {dimension_numbers = #tpu.dot_dimension_numbers<[2], [2], [1], [1], [0, 0, 0, 1, 1, 1], [0], [0]>} : vector<2x8x8xf32>, vector<2x8x8xf32>, vector<2x8x8xf32> -> vector<2x8x8xf32>
    "tpu.trace_stop"() : () -> ()
    %268 = arith.addf %267, %8 : vector<2x8x8xf32>
    %cst_85 = arith.constant dense<0xFF800000> : vector<2x8xf32>
    %269 = vector.multi_reduction <maximumf>, %268, %cst_85 [2] : vector<2x8x8xf32> to vector<2x8xf32>
    %270 = vector.shape_cast %269 : vector<2x8xf32> to vector<2x8x1xf32>
    %271 = vector.broadcast %270 : vector<2x8x1xf32> to vector<2x8x8xf32>
    %272 = arith.subf %268, %271 : vector<2x8x8xf32>
    %273 = math.exp %272 : vector<2x8x8xf32>
    %cst_86 = arith.constant dense<0.000000e+00> : vector<2x8xf32>
    %274 = vector.multi_reduction <add>, %273, %cst_86 [2] : vector<2x8x8xf32> to vector<2x8xf32>
    %275 = vector.shape_cast %274 : vector<2x8xf32> to vector<2x8x1xf32>
    %276 = tpu.reciprocal %275 {approx = true} : vector<2x8x1xf32> -> vector<2x8x1xf32>
    %277 = vector.broadcast %276 : vector<2x8x1xf32> to vector<2x8x8xf32>
    %278 = arith.mulf %273, %277 : vector<2x8x8xf32>
    "tpu.trace_start"() <{level = 10 : i32, message = "bqk,bkd->bqd"}> : () -> ()
    %cst_87 = arith.constant dense<0.000000e+00> : vector<2x8x8xf32>
    %279 = tpu.matmul %278, %266, %cst_87 {dimension_numbers = #tpu.dot_dimension_numbers<[2], [1], [1], [2], [0, 0, 0, 1, 1, 2], [0], [0]>} : vector<2x8x8xf32>, vector<2x8x8xf32>, vector<2x8x8xf32> -> vector<2x8x8xf32>
    "tpu.trace_stop"() : () -> ()
    %280 = vector.shape_cast %279 : vector<2x8x8xf32> to vector<16x8xf32>
    %c0_88 = arith.constant 0 : index
    %c16_89 = arith.constant 16 : index
    %281 = vector.load %arg8[%c0_88, %c16_89] : memref<16x32xf32, #tpu.memory_space<vmem>>, vector<16x8xf32>
    tpu.vector_store %arg8[%c0_88, %c16_89], %280 {strides = array<i32>} : memref<16x32xf32, #tpu.memory_space<vmem>>, vector<16x8xf32>,
    %282 = vector.extract_strided_slice %216 {offsets = [0, 24], sizes = [16, 8], strides = [1, 1]} : vector<16x32xf32> to vector<16x8xf32>
    %283 = vector.shape_cast %282 : vector<16x8xf32> to vector<2x8x8xf32>
    %284 = vector.extract_strided_slice %217 {offsets = [0, 24], sizes = [16, 8], strides = [1, 1]} : vector<16x32xf32> to vector<16x8xf32>
    %285 = vector.shape_cast %284 : vector<16x8xf32> to vector<2x8x8xf32>
    %286 = vector.extract_strided_slice %218 {offsets = [0, 24], sizes = [16, 8], strides = [1, 1]} : vector<16x32xf32> to vector<16x8xf32>
    %287 = vector.shape_cast %286 : vector<16x8xf32> to vector<2x8x8xf32>
    "tpu.trace_start"() <{level = 10 : i32, message = "bqd,bkd->bqk"}> : () -> ()
    %cst_90 = arith.constant dense<0.000000e+00> : vector<2x8x8xf32>
    %288 = tpu.matmul %283, %285, %cst_90 {dimension_numbers = #tpu.dot_dimension_numbers<[2], [2], [1], [1], [0, 0, 0, 1, 1, 1], [0], [0]>} : vector<2x8x8xf32>, vector<2x8x8xf32>, vector<2x8x8xf32> -> vector<2x8x8xf32>
    "tpu.trace_stop"() : () -> ()
    %289 = arith.addf %288, %8 : vector<2x8x8xf32>
    %cst_91 = arith.constant dense<0xFF800000> : vector<2x8xf32>
    %290 = vector.multi_reduction <maximumf>, %289, %cst_91 [2] : vector<2x8x8xf32> to vector<2x8xf32>
    %291 = vector.shape_cast %290 : vector<2x8xf32> to vector<2x8x1xf32>
    %292 = vector.broadcast %291 : vector<2x8x1xf32> to vector<2x8x8xf32>
    %293 = arith.subf %289, %292 : vector<2x8x8xf32>
    %294 = math.exp %293 : vector<2x8x8xf32>
    %cst_92 = arith.constant dense<0.000000e+00> : vector<2x8xf32>
    %295 = vector.multi_reduction <add>, %294, %cst_92 [2] : vector<2x8x8xf32> to vector<2x8xf32>
    %296 = vector.shape_cast %295 : vector<2x8xf32> to vector<2x8x1xf32>
    %297 = tpu.reciprocal %296 {approx = true} : vector<2x8x1xf32> -> vector<2x8x1xf32>
    %298 = vector.broadcast %297 : vector<2x8x1xf32> to vector<2x8x8xf32>
    %299 = arith.mulf %294, %298 : vector<2x8x8xf32>
    "tpu.trace_start"() <{level = 10 : i32, message = "bqk,bkd->bqd"}> : () -> ()
    %cst_93 = arith.constant dense<0.000000e+00> : vector<2x8x8xf32>
    %300 = tpu.matmul %299, %287, %cst_93 {dimension_numbers = #tpu.dot_dimension_numbers<[2], [1], [1], [2], [0, 0, 0, 1, 1, 2], [0], [0]>} : vector<2x8x8xf32>, vector<2x8x8xf32>, vector<2x8x8xf32> -> vector<2x8x8xf32>
    "tpu.trace_stop"() : () -> ()
    %301 = vector.shape_cast %300 : vector<2x8x8xf32> to vector<16x8xf32>
    %c0_94 = arith.constant 0 : index
    %c24_95 = arith.constant 24 : index
    %302 = vector.load %arg8[%c0_94, %c24_95] : memref<16x32xf32, #tpu.memory_space<vmem>>, vector<16x8xf32>
    tpu.vector_store %arg8[%c0_94, %c24_95], %301 {strides = array<i32>} : memref<16x32xf32, #tpu.memory_space<vmem>>, vector<16x8xf32>,
    %c0_96 = arith.constant 0 : index
    %c0_97 = arith.constant 0 : index
    %303 = vector.load %arg8[%c0_96, %c0_97] : memref<16x32xf32, #tpu.memory_space<vmem>>, vector<16x32xf32>
    %c1_98 = arith.constant 1 : index
    %c0_99 = arith.constant 0 : index
    %c0_100 = arith.constant 0 : index
    %304 = vector.load %arg3[%c1_98, %c0_99, %c0_100] : memref<2x32x32xf32, #tpu.memory_space<vmem>>, vector<1x32x32xf32>
    %305 = vector.shape_cast %304 : vector<1x32x32xf32> to vector<32x32xf32>
    %cst_101 = arith.constant dense<0.000000e+00> : vector<16x32xf32>
    %306 = tpu.matmul %303, %305, %cst_101 {dimension_numbers = #tpu.dot_dimension_numbers<[1], [0], [0], [1], [0, 0, 1, 1], [], []>} : vector<16x32xf32>, vector<32x32xf32>, vector<16x32xf32> -> vector<16x32xf32>
    %307 = arith.addf %176, %306 : vector<16x32xf32>
    %308 = vector.broadcast %180 : vector<1x32xf32> to vector<16x32xf32>
    %309 = arith.addf %307, %308 : vector<16x32xf32>
    %cst_102 = arith.constant dense<0.000000e+00> : vector<16xf32>
    %310 = vector.multi_reduction <add>, %309, %cst_102 [1] : vector<16x32xf32> to vector<16xf32>
    %311 = vector.shape_cast %310 : vector<16xf32> to vector<16x1xf32>
    %cst_103 = arith.constant 3.200000e+01 : f32
    %312 = vector.broadcast %cst_103 : f32 to vector<16x1xf32>
    %313 = arith.divf %311, %312 : vector<16x1xf32>
    %314 = vector.broadcast %313 : vector<16x1xf32> to vector<16x32xf32>
    %315 = arith.subf %309, %314 : vector<16x32xf32>
    %316 = arith.mulf %315, %315 : vector<16x32xf32>
    %cst_104 = arith.constant dense<0.000000e+00> : vector<16xf32>
    %317 = vector.multi_reduction <add>, %316, %cst_104 [1] : vector<16x32xf32> to vector<16xf32>
    %318 = vector.shape_cast %317 : vector<16xf32> to vector<16x1xf32>
    %cst_105 = arith.constant 3.100000e+01 : f32
    %319 = vector.broadcast %cst_105 : f32 to vector<16x1xf32>
    %320 = arith.divf %318, %319 : vector<16x1xf32>
    %321 = math.sqrt %320 : vector<16x1xf32>
    %322 = vector.broadcast %313 : vector<16x1xf32> to vector<16x32xf32>
    %323 = arith.subf %309, %322 : vector<16x32xf32>
    %324 = vector.broadcast %183 : vector<1x32xf32> to vector<16x32xf32>
    %325 = arith.mulf %324, %323 : vector<16x32xf32>
    %cst_106 = arith.constant 9.99999997E-7 : f32
    %326 = vector.broadcast %cst_106 : f32 to vector<16x1xf32>
    %327 = arith.addf %321, %326 : vector<16x1xf32>
    %328 = vector.broadcast %327 : vector<16x1xf32> to vector<16x32xf32>
    %329 = arith.divf %325, %328 : vector<16x32xf32>
    %330 = vector.broadcast %184 : vector<1x32xf32> to vector<16x32xf32>
    %331 = arith.addf %329, %330 : vector<16x32xf32>
    %c1_107 = arith.constant 1 : index
    %c0_108 = arith.constant 0 : index
    %c0_109 = arith.constant 0 : index
    %332 = vector.load %arg4[%c1_107, %c0_108, %c0_109] : memref<2x32x64xf32, #tpu.memory_space<vmem>>, vector<1x32x64xf32>
    %333 = vector.shape_cast %332 : vector<1x32x64xf32> to vector<32x64xf32>
    %cst_110 = arith.constant dense<0.000000e+00> : vector<16x64xf32>
    %334 = tpu.matmul %331, %333, %cst_110 {dimension_numbers = #tpu.dot_dimension_numbers<[1], [0], [0], [1], [0, 0, 1, 1], [], []>} : vector<16x32xf32>, vector<32x64xf32>, vector<16x64xf32> -> vector<16x64xf32>
    %335 = vector.broadcast %185 : vector<1x64xf32> to vector<16x64xf32>
    %336 = arith.addf %334, %335 : vector<16x64xf32>
    %cst_111 = arith.constant 0.000000e+00 : f32
    %337 = vector.broadcast %cst_111 : f32 to vector<16x64xf32>
    %338 = arith.maximumf %336, %337 : vector<16x64xf32>
    %c1_112 = arith.constant 1 : index
    %c0_113 = arith.constant 0 : index
    %c0_114 = arith.constant 0 : index
    %339 = vector.load %arg5[%c1_112, %c0_113, %c0_114] : memref<2x64x32xf32, #tpu.memory_space<vmem>>, vector<1x64x32xf32>
    %340 = vector.shape_cast %339 : vector<1x64x32xf32> to vector<64x32xf32>
    %cst_115 = arith.constant dense<0.000000e+00> : vector<16x32xf32>
    %341 = tpu.matmul %338, %340, %cst_115 {dimension_numbers = #tpu.dot_dimension_numbers<[1], [0], [0], [1], [0, 0, 1, 1], [], []>} : vector<16x64xf32>, vector<64x32xf32>, vector<16x32xf32> -> vector<16x32xf32>
    %342 = arith.addf %309, %341 : vector<16x32xf32>
    %343 = vector.broadcast %186 : vector<1x32xf32> to vector<16x32xf32>
    %344 = arith.addf %342, %343 : vector<16x32xf32>
    %c2 = arith.constant 2 : index
    %c0_116 = arith.constant 0 : index
    %c0_117 = arith.constant 0 : index
    %345 = vector.load %arg6[%c2, %c0_116, %c0_117] : memref<3x8x128xf32, #tpu.memory_space<vmem>>, vector<1x8x128xf32>
    %346 = vector.shape_cast %345 : vector<1x8x128xf32> to vector<8x128xf32>
    %347 = vector.extract_strided_slice %346 {offsets = [0, 0], sizes = [1, 32], strides = [1, 1]} : vector<8x128xf32> to vector<1x32xf32>
    %348 = vector.extract_strided_slice %346 {offsets = [1, 0], sizes = [1, 32], strides = [1, 1]} : vector<8x128xf32> to vector<1x32xf32>
    %cst_118 = arith.constant dense<0.000000e+00> : vector<16xf32>
    %349 = vector.multi_reduction <add>, %344, %cst_118 [1] : vector<16x32xf32> to vector<16xf32>
    %350 = vector.shape_cast %349 : vector<16xf32> to vector<16x1xf32>
    %cst_119 = arith.constant 3.200000e+01 : f32
    %351 = vector.broadcast %cst_119 : f32 to vector<16x1xf32>
    %352 = arith.divf %350, %351 : vector<16x1xf32>
    %353 = vector.broadcast %352 : vector<16x1xf32> to vector<16x32xf32>
    %354 = arith.subf %344, %353 : vector<16x32xf32>
    %355 = arith.mulf %354, %354 : vector<16x32xf32>
    %cst_120 = arith.constant dense<0.000000e+00> : vector<16xf32>
    %356 = vector.multi_reduction <add>, %355, %cst_120 [1] : vector<16x32xf32> to vector<16xf32>
    %357 = vector.shape_cast %356 : vector<16xf32> to vector<16x1xf32>
    %cst_121 = arith.constant 3.100000e+01 : f32
    %358 = vector.broadcast %cst_121 : f32 to vector<16x1xf32>
    %359 = arith.divf %357, %358 : vector<16x1xf32>
    %360 = math.sqrt %359 : vector<16x1xf32>
    %361 = vector.broadcast %352 : vector<16x1xf32> to vector<16x32xf32>
    %362 = arith.subf %344, %361 : vector<16x32xf32>
    %363 = vector.broadcast %347 : vector<1x32xf32> to vector<16x32xf32>
    %364 = arith.mulf %363, %362 : vector<16x32xf32>
    %cst_122 = arith.constant 9.99999997E-7 : f32
    %365 = vector.broadcast %cst_122 : f32 to vector<16x1xf32>
    %366 = arith.addf %360, %365 : vector<16x1xf32>
    %367 = vector.broadcast %366 : vector<16x1xf32> to vector<16x32xf32>
    %368 = arith.divf %364, %367 : vector<16x32xf32>
    %369 = vector.broadcast %348 : vector<1x32xf32> to vector<16x32xf32>
    %370 = arith.addf %368, %369 : vector<16x32xf32>
    %c0_123 = arith.constant 0 : index
    %c0_124 = arith.constant 0 : index
    %371 = vector.load %arg7[%c0_123, %c0_124] : memref<16x32xf32, #tpu.memory_space<vmem>>, vector<16x32xf32>
    tpu.vector_store %arg7[%c0_123, %c0_124], %370 {strides = array<i32>} : memref<16x32xf32, #tpu.memory_space<vmem>>, vector<16x32xf32>,
    return
  }
}

</mosaic_0001>

<bundles_post_ra>
// kernel: tpu_custom_call.1
= control target key start
LH: loop header
LB: loop body
LE: loop exit
PB: predicated region body
PF: predicated region fallthrough
CT: control target
= control target key end

     0   :  { %12 = vsyncpa [#allocation4], 0  ;;  %s5298_s0 = inlined_call_operand.hbm [shape: f32[16,32], index: 0, kind: input, shape index: {}]   ;;  %s5299_s1 = inlined_call_operand.vmem [shape: f32[2,1,8], index: 1, kind: input, shape index: {}]   ;;  %s5300_s2 = inlined_call_operand.vmem [shape: f32[2,32,96], index: 2, kind: input, shape index: {}]   ;;  %s5301_s3 = inlined_call_operand.vmem [shape: f32[2,32,32], index: 3, kind: input, shape index: {}]   ;;  %s5302_s4 = inlined_call_operand.vmem [shape: f32[2,32,64], index: 4, kind: input, shape index: {}]   ;;  %s5303_s5 = inlined_call_operand.vmem [shape: f32[2,64,32], index: 5, kind: input, shape index: {}]   ;;  %s5304_s6 = inlined_call_operand.hbm [shape: f32[3,8,128], index: 6, kind: input, shape index: {}]   ;;  %s5305_s7 = inlined_call_operand.hbm [shape: f32[16,32], index: 7, kind: output, shape index: {}]  }
   0x1   :  { %13 = vsyncpa [#allocation7], 0 }
   0x2   :  { %14 = vsyncpa [#allocation5], 0  ;;  %s4568_s24 = smov [#allocation3]   ;;  %s4496_s28 = scalar_lea.hbm %s5298_s0, 256 }
   0x3   :  { %s20_s25 = sshll.u32 %s4568_s24, 4  ;;  %p4497_p0 = scmp.ne.s32.totalorder %s5298_s0, %s4496_s28  ;;  %s21_s25 = int_to_ptr.vmem [resolvable:$true] %s20_s25 }
   0x4   :  { %p4500_p1 = scmp.lt.u32.totalorder %s4496_s28, %s5298_s0 }
   0x6   :  { %p4502_p2 = pnand %p4500_p1, %p4497_p0 }
   0x8   :  { %4505 = shalt.err (!%p4502_p2)
}
   0x9   :  { %s4506_s10 = scalar_lea.vmem %s21_s25, 256  ;;  %p4511_p4 = scmp.lt.s32.totalorder %s21_s25, %s21_s25 }
   0xa   :  { %p4507_p3 = scmp.ne.s32.totalorder %s21_s25, %s4506_s10  ;;  %p4512_p5 = scmp.lt.s32.totalorder %s4506_s10, %s4506_s10 }
   0xc   :  { %p4513_p6 = por %p4512_p5, %p4511_p4 }
   0xe   :  { %p4514_p7 = pnand %p4513_p6, %p4507_p3 }
  0x10   :  { %4517 = shalt.err (!%p4514_p7)
}
  0x11   :  { %s4569_s11 = smov 128   ;;  %s4570_s12 = smov 8  }
  0x12   :  { %26 = dma.hbm_to_vmem [thread:$0]  %s5298_s0, 256, %s21_s25, [#allocation4], %s4569_s11, %s4569_s11, %s4570_s12  }
  0x13   :  { %s4571_s15 = smov [#allocation6]   ;;  %s4518_s19 = scalar_lea.hbm %s5304_s6, 384 }
  0x14   :  { %s42_s16 = sshll.u32 %s4571_s15, 4  ;;  %p4519_p8 = scmp.ne.s32.totalorder %s5304_s6, %s4518_s19  ;;  %s43_s16 = int_to_ptr.vmem [resolvable:$true] %s42_s16 }
  0x15   :  { %p4522_p9 = scmp.lt.u32.totalorder %s4518_s19, %s5304_s6 }
  0x17   :  { %p4524_p10 = pnand %p4522_p9, %p4519_p8 }
  0x19   :  { %4527 = shalt.err (!%p4524_p10)
}
  0x1a   :  { %s4528_s24 = scalar_lea.vmem %s43_s16, 384  ;;  %p4533_p12 = scmp.lt.s32.totalorder %s43_s16, %s43_s16 }
  0x1b   :  { %p4529_p11 = scmp.ne.s32.totalorder %s43_s16, %s4528_s24  ;;  %p4534_p13 = scmp.lt.s32.totalorder %s4528_s24, %s4528_s24 }
  0x1d   :  { %p4535_p0 = por %p4534_p13, %p4533_p12 }
  0x1f   :  { %p4536_p1 = pnand %p4535_p0, %p4529_p11 }
  0x21   :  { %4539 = shalt.err (!%p4536_p1)
}
  0x22   :  { %48 = dma.hbm_to_vmem [thread:$0]  %s5304_s6, 384, %s43_s16, [#allocation7], %s4569_s11, %s4569_s11, %s4570_s12  }
  0x23   :  { %4562 = dma.done.wait [#allocation4], 256  }
  0x24   :  { %4563 = vsyncadd [#allocation4], 4294967040 }
  0x25   :  { %4564 = dma.done.wait [#allocation7], 384  }
  0x26   :  { %4565 = vsyncadd [#allocation7], 4294966912  ;;  %vm76_vm0 = vcmask 261120   ;;  %v4658_v0 = vld [vmem:[#allocation3] sm:$0xff]  ;;  %v4660_v1 = vld [vmem:[#allocation3 + $0x8] sm:$0xff]  ;;  %v4572_v20 = vmov 0.0   ;;  %v65_v26 = vlaneseq }
  0x27   :  { %v77_v2 = vsel %vm76_vm0, %v4658_v0, 0.0  ;;  %v80_v3 = vsel %vm76_vm0, %v4660_v1, 0.0  ;;  %v131_v14 = vld [vmem:[%s5300_s2] sm:$0xff]  ;;  %v132_v15 = vld [vmem:[%s5300_s2 + $0x8] sm:$0xff]  ;;  %v133_v16 = vld [vmem:[%s5300_s2 + $0x10] sm:$0xff]  ;;  %4049 = vmatprep.subr.mxu0 %v4572_v20  ;;  %vm4573_vm5 = vmmov 0  }
  0x28   :  { %78 = vadd.xlane.f32.xlu0 %v77_v2  ;;  %v4292_v17 = vpack.c.bf16 %v132_v15, %v131_v14  ;;  %v134_v18 = vld [vmem:[%s5300_s2 + $0x18] sm:$0xff]  ;;  %v4684_v31 = vshrl.u32 %v65_v26, 7  ;;  %v4687_v39 = vld [vmem:[#allocation6] sm:$0xff]  ;;  %4051 = vmatprep.mubr.msk.f32.mxu0 %vm4573_vm5, %v4572_v20  ;;  %s4574_s10 = smov 96   ;;  %vm225_vm6 = vcmask 64512   ;;  %s4576_s17 = smov 88  }
  0x29   :  { %v4296_v19 = vpack.c.bf16 %v134_v18, %v133_v16  ;;  %v57_v62 = vld [vmem:[%s5299_s1] sm:$0x1]  ;;  %v58_v63 = vld [vmem:[%s5299_s1 + $0x1] sm:$0x1]  ;;  %s4575_s1 = smov 64   ;;  %s4577_s18 = smov 120  }
  0x2a   :  { %4293 = vmatprep.subr.bf16.mxu1 %v4292_v17  ;;  %v115_v37 = vsub.s32 2, %v4684_v31  ;;  %v127_v42 = vsub.s32 3, %v4684_v31  ;;  %v4703_v52 = vsub.s32 0, %v4684_v31  ;;  %vm59_vm7 = vcmp.eq.f32.partialorder %v57_v62, 0.0  ;;  %s4578_s19 = smov 56   ;;  %s4579_s20 = smov 80  }
  0x2b   :  { %4295 = vmatpush3.bf16.msra.mxu1 %v4292_v17  ;;  %v61_v2 = vsel %vm59_vm7, -1e+09, %v4572_v20  ;;  %vm60_vm8 = vcmp.eq.f32.partialorder %v58_v63, 0.0  ;;  %s4580_s21 = smov 112   ;;  %s4581_s22 = smov 48   ;;  %vm893_vm9 = vcmask 130112  }
  0x2c   :  { %81 = vadd.xlane.f32.xlu0 %v80_v3  ;;  %4297 = vmatprep.subr.bf16.mxu1 %v4296_v19  ;;  %v116_v41 = vrot.slane %v4687_v39, %v115_v37  ;;  %v128_v44 = vrot.slane %v4687_v39, %v127_v42  ;;  %v138_v53 = vrot.slane %v4687_v39, %v4703_v52  ;;  %s4582_s23 = smov 72   ;;  %s4583_s24 = smov 104   ;;  %vm1234_vm10 = vcmask 195712  }
  0x2d   :  { %v4741_v3 = vrot.slane %v61_v2, %v4703_v52  ;;  %s4584_s0 = smov 40   ;;  %s4585_s25 = smov 16   ;;  %vm1575_vm11 = vcmask 261312  }
  0x2e   :  { %s4586_s13 = smov 24  }
  0x2f   :  { %4299 = vmatpush3.bf16.msra.mxu1 %v4296_v19 }
  0x30   :  { %4039 = vmatprep.subr.mxu1 %v4572_v20 }
  0xb5   :  { %v79_v4 = vpop.xlane.xlu0 %78 }
  0xb6   :  { %v84_v5 = vmul.f32 0.03125, %v79_v4  ;;  %v62_v4 = vsel %vm60_vm8, -1e+09, %v4572_v20 }
  0xb8   :  { %v86_v6 = vsub.f32 %v4658_v0, %v84_v5 }
  0xb9   :  { %v82_v7 = vpop.xlane.xlu0 %81 }
  0xba   :  { %v85_v8 = vmul.f32 0.03125, %v82_v7  ;;  %v88_v9 = vmul.f32 %v86_v6, %v86_v6  ;;  %v117_v43 = vmul.f32 %v116_v41, %v86_v6  ;;  %v4745_v6 = vrot.slane %v62_v4, %v4703_v52 }
  0xbc   :  { %v87_v10 = vsub.f32 %v4660_v1, %v85_v8  ;;  %v90_v11 = vsel %vm76_vm0, %v88_v9, 0.0 }
  0xbd   :  { %91 = vadd.xlane.f32.xlu1 %v90_v11 }
  0xbe   :  { %v89_v12 = vmul.f32 %v87_v10, %v87_v10  ;;  %v118_v47 = vmul.f32 %v116_v41, %v87_v10 }
  0xc0   :  { %v93_v13 = vsel %vm76_vm0, %v89_v12, 0.0 }
  0xc1   :  { %94 = vadd.xlane.f32.xlu1 %v93_v13 }
 0x14a   :  { %v92_v21 = vpop.xlane.xlu1 %91 }
 0x14b   :  { %v97_v22 = vmul.f32 0.032258064, %v92_v21 }
 0x14d   :  { %4392 = vrsqrt.f32 %v97_v22  ;;  %vm101_vm1 = vcmp.eq.f32.partialorder %v97_v22, inf  ;;  %v104_v28 = vand.u32 2147483648, %v97_v22  ;;  %vm103_vm2 = vcmp.eq.f32.partialorder %v97_v22, 0.0 }
 0x14e   :  { %v95_v23 = vpop.xlane.xlu1 %94 }
 0x14f   :  { %v98_v24 = vmul.f32 0.032258064, %v95_v23 }
 0x151   :  { %4394 = vrsqrt.f32 %v98_v24  ;;  %vm108_vm3 = vcmp.eq.f32.partialorder %v98_v24, inf  ;;  %v111_v35 = vand.u32 2147483648, %v98_v24  ;;  %vm110_vm4 = vcmp.eq.f32.partialorder %v98_v24, 0.0 }
 0x157   :  { %v4393_v25 = vpop.eup %4392 }
 0x158   :  { %v100_v27 = vmul.f32 %v4393_v25, %v97_v22 }
 0x15a   :  { %v102_v29 = vsel %vm101_vm1, %v97_v22, %v100_v27  ;;  %vm1824_vm1 = vcmask 523264  }
 0x15b   :  { %v4395_v30 = vpop.eup %4394  ;;  %v105_v32 = vsel %vm103_vm2, %v104_v28, %v102_v29 }
 0x15c   :  { %v107_v33 = vmul.f32 %v4395_v30, %v98_v24  ;;  %v119_v34 = vadd.f32 1e-06, %v105_v32 }
 0x15e   :  { %v109_v36 = vsel %vm108_vm3, %v98_v24, %v107_v33  ;;  %4396 = vrcp.f32 %v119_v34 }
 0x15f   :  { %v112_v38 = vsel %vm110_vm4, %v111_v35, %v109_v36 }
 0x160   :  { %v120_v40 = vadd.f32 1e-06, %v112_v38 }
 0x162   :  { %4398 = vrcp.f32 %v120_v40 }
 0x168   :  { %v4397_v45 = vpop.eup %4396 }
 0x169   :  { %v122_v46 = vmul.f32 %v4397_v45, %v117_v43 }
 0x16b   :  { %v129_v48 = vadd.f32 %v128_v44, %v122_v46 }
 0x16c   :  { %v4399_v49 = vpop.eup %4398 }
 0x16d   :  { %v124_v50 = vmul.f32 %v4399_v49, %v118_v47  ;;  %4036 = vmatprep.mubr.msk.f32.mxu1 %vm76_vm0, %v129_v48 }
 0x16f   :  { %v130_v51 = vadd.f32 %v128_v44, %v124_v50 }
 0x171   :  { %4037 = vmatmul.mubr.msk.f32.vlgmr.msra.gmra.mrb[0].mxu1 %vm76_vm0, %v130_v51 }
 0x172   :  { %4041 = vmatprep.mubr.msk.f32.mxu1 %vm4573_vm5, %v4572_v20 }
 0x244   :  { %v4038_v54 = vpop.f32.mrb[0].mxu1 }
 0x245   :  { %v4707_v55 = vadd.f32 %v4038_v54, %v138_v53  ;;  %v211_v56 = vpop.f32.mrb[1].mxu1 }
 0x246   :  { %v4709_v57 = vadd.f32 %v211_v56, %v138_v53 }
 0x247   :  { %302 = vrot.lane.b32.xlu1 %v4707_v55, %s4574_s10  ;;  %v4726_v61 = vmul.f32 0.35355338, %v4707_v55 }
 0x248   :  { %223 = vrot.lane.b32.xlu0 %v4709_v57, %s4574_s10  ;;  %v4717_v59 = vmul.f32 0.35355338, %v4709_v57 }
 0x2b9   :  { %v303_v60 = vpop.permute.xlu1 %302 }
 0x2ba   :  { %v224_v58 = vpop.permute.xlu0 %223 }
 0x2bb   :  { %4040 = vmatpush3.xpose.msk.msra.mxu1 %vm225_vm6, %v224_v58 }
 0x2bc   :  { %4044 = vmatprep.subr.mxu1 %v4572_v20 }
 0x2be   :  { %4042 = vmatmul.mubr.msk.f32.vlgmr.msra.gmra.mrb[2].mxu1 %vm225_vm6, %v4717_v59 }
 0x2bf   :  { %4045 = vmatpush3.xpose.msk.msra.mxu1 %vm225_vm6, %v303_v60  ;;  %4046 = vmatprep.mubr.msk.f32.mxu1 %vm4573_vm5, %v4572_v20 }
 0x2c0   :  { %4054 = vmatprep.subr.mxu1 %v4572_v20 }
 0x2c2   :  { %4047 = vmatmul.mubr.msk.f32.vlgmr.msra.gmra.mrb[4].mxu1 %vm225_vm6, %v4726_v61 }
 0x2c3   :  { %4056 = vmatprep.mubr.msk.f32.mxu1 %vm4573_vm5, %v4572_v20 }
 0x391   :  { %v297_v5 = vpop.f32.mrb[2].mxu1 }
 0x392   :  { %v298_v7 = vadd.f32 %v297_v5, %v4741_v3  ;;  %v4043_v8 = vpop.f32.mrb[3].mxu1 }
 0x394   :  { %v379_v9 = vsel %vm225_vm6, %v298_v7, -inf }
 0x395   :  { %380 = vmax.xlane.f32.xlu1 %v379_v9  ;;  %v375_v10 = vpop.f32.mrb[4].mxu1 }
 0x396   :  { %v376_v11 = vadd.f32 %v375_v10, %v4745_v6  ;;  %v4048_v12 = vpop.f32.mrb[5].mxu1 }
 0x398   :  { %v382_v13 = vsel %vm225_vm6, %v376_v11, -inf }
 0x399   :  { %383 = vmax.xlane.f32.xlu0 %v382_v13 }
 0x3a6   :  { %477 = vrot.lane.b32.xlu1 %v4707_v55, %s4575_s1 }
 0x3aa   :  { %557 = vrot.lane.b32.xlu1 %v4709_v57, %s4576_s17 }
 0x3ae   :  { %635 = vrot.lane.b32.xlu1 %v4707_v55, %s4576_s17 }
 0x3af   :  { %401 = vrot.lane.b32.xlu0 %v4709_v57, %s4575_s1 }
 0x422   :  { %v381_v14 = vpop.xlane.xlu1 %380 }
 0x423   :  { %v385_v15 = vsub.f32 %v298_v7, %v381_v14 }
 0x425   :  { %v387_v16 = vmul.f32 1.442695, %v385_v15 }
 0x426   :  { %v478_v17 = vpop.permute.xlu1 %477  ;;  %v384_v18 = vpop.xlane.xlu0 %383 }
 0x427   :  { %4400 = vpow2.f32 %v387_v16  ;;  %v386_v19 = vsub.f32 %v376_v11, %v384_v18  ;;  %4055 = vmatpush3.msra.mxu1 %v478_v17 }
 0x428   :  { %4064 = vmatprep.subr.mxu1 %v4572_v20 }
 0x429   :  { %v389_v21 = vmul.f32 1.442695, %v386_v19 }
 0x42a   :  { %v402_v22 = vpop.permute.xlu0 %401  ;;  %v558_v27 = vpop.permute.xlu1 %557 }
 0x42b   :  { %4402 = vpow2.f32 %v389_v21  ;;  %4050 = vmatpush3.msra.mxu0 %v402_v22 }
 0x42c   :  { %4059 = vmatprep.subr.mxu0 %v4572_v20 }
 0x42e   :  { %v636_v28 = vpop.permute.xlu1 %635 }
 0x431   :  { %v4401_v23 = vpop.eup %4400 }
 0x432   :  { %v391_v24 = vsel %vm225_vm6, %v4401_v23, 0.0 }
 0x433   :  { %392 = vadd.xlane.f32.xlu0 %v391_v24 }
 0x435   :  { %v4403_v25 = vpop.eup %4402 }
 0x436   :  { %v394_v26 = vsel %vm225_vm6, %v4403_v25, 0.0 }
 0x437   :  { %395 = vadd.xlane.f32.xlu1 %v394_v26 }
 0x448   :  { %633 = vrot.lane.b32.xlu1 %v4726_v61, %s4577_s18 }
 0x449   :  { %555 = vrot.lane.b32.xlu0 %v4717_v59, %s4577_s18 }
 0x4c0   :  { %v393_v29 = vpop.xlane.xlu0 %392 }
 0x4c1   :  { %4404 = vrcp.f32 %v393_v29 }
 0x4c4   :  { %v396_v30 = vpop.xlane.xlu1 %395  ;;  %v556_v36 = vpop.permute.xlu0 %555 }
 0x4c5   :  { %4406 = vrcp.f32 %v396_v30 }
 0x4c8   :  { %v634_v38 = vpop.permute.xlu1 %633 }
 0x4cb   :  { %v4405_v32 = vpop.eup %4404 }
 0x4cc   :  { %v399_v33 = vmul.f32 %v4405_v32, %v4401_v23 }
 0x4ce   :  { %4052 = vmatmul.mubr.msk.f32.vlgmr.msra.gmra.mrb[0].mxu0 %vm225_vm6, %v399_v33 }
 0x4cf   :  { %v4407_v34 = vpop.eup %4406  ;;  %4060 = vmatpush3.xpose.msk.msra.mxu0 %vm225_vm6, %v558_v27  ;;  %4061 = vmatprep.mubr.msk.f32.mxu0 %vm4573_vm5, %v4572_v20 }
 0x4d0   :  { %v400_v35 = vmul.f32 %v4407_v34, %v4403_v25  ;;  %4069 = vmatprep.subr.mxu0 %v4572_v20 }
 0x4d2   :  { %4057 = vmatmul.mubr.msk.f32.vlgmr.msra.gmra.mrb[6].mxu1 %vm225_vm6, %v400_v35  ;;  %4062 = vmatmul.mubr.msk.f32.vlgmr.msra.gmra.mrb[2].mxu0 %vm225_vm6, %v556_v36 }
 0x4d3   :  { %4065 = vmatpush3.xpose.msk.msra.mxu1 %vm225_vm6, %v636_v28  ;;  %4066 = vmatprep.mubr.msk.f32.mxu1 %vm4573_vm5, %v4572_v20 }
 0x4d4   :  { %4074 = vmatprep.subr.mxu1 %v4572_v20  ;;  %4071 = vmatprep.mubr.msk.f32.mxu0 %vm4573_vm5, %v4572_v20 }
 0x4d6   :  { %4067 = vmatmul.mubr.msk.f32.vlgmr.msra.gmra.mrb[8].mxu1 %vm225_vm6, %v634_v38 }
 0x4d7   :  { %4076 = vmatprep.mubr.msk.f32.mxu1 %vm4573_vm5, %v4572_v20 }
 0x5a1   :  { %v473_v40 = vpop.f32.mrb[0].mxu0 }
 0x5a2   :  { %553 = vst.msk [vmem:[#allocation2] sm:$0xff] %vm225_vm6, %v473_v40  ;;  %v4053_v41 = vpop.f32.mrb[1].mxu0 }
 0x5a5   :  { %v549_v43 = vpop.f32.mrb[6].mxu1  ;;  %v629_v44 = vpop.f32.mrb[2].mxu0 }
 0x5a6   :  { %554 = vst.msk [vmem:[#allocation2 + $0x8] sm:$0xff] %vm225_vm6, %v549_v43  ;;  %v630_v45 = vadd.f32 %v629_v44, %v4741_v3  ;;  %v4058_v46 = vpop.f32.mrb[7].mxu1  ;;  %v4063_v47 = vpop.f32.mrb[3].mxu0 }
 0x5a8   :  { %v711_v48 = vsel %vm225_vm6, %v630_v45, -inf }
 0x5a9   :  { %712 = vmax.xlane.f32.xlu0 %v711_v48  ;;  %v707_v49 = vpop.f32.mrb[8].mxu1 }
 0x5aa   :  { %v708_v50 = vadd.f32 %v707_v49, %v4745_v6  ;;  %v4068_v51 = vpop.f32.mrb[9].mxu1 }
 0x5ac   :  { %v714_v53 = vsel %vm225_vm6, %v708_v50, -inf }
 0x5ad   :  { %715 = vmax.xlane.f32.xlu1 %v714_v53 }
 0x5be   :  { %809 = vrot.lane.b32.xlu1 %v4707_v55, %s4578_s19 }
 0x5bf   :  { %733 = vrot.lane.b32.xlu0 %v4709_v57, %s4578_s19 }
 0x5c2   :  { %898 = vrot.lane.b32.xlu1 %v4709_v57, %s4579_s20 }
 0x5c6   :  { %976 = vrot.lane.b32.xlu1 %v4707_v55, %s4579_s20 }
 0x5ca   :  { %974 = vrot.lane.b32.xlu1 %v4726_v61, %s4580_s21 }
 0x636   :  { %v713_v54 = vpop.xlane.xlu0 %712 }
 0x637   :  { %v717_v56 = vsub.f32 %v630_v45, %v713_v54 }
 0x639   :  { %v719_v58 = vmul.f32 1.442695, %v717_v56 }
 0x63a   :  { %v734_v60 = vpop.permute.xlu0 %733  ;;  %v716_v62 = vpop.xlane.xlu1 %715 }
 0x63b   :  { %4408 = vpow2.f32 %v719_v58  ;;  %v718_v63 = vsub.f32 %v708_v50, %v716_v62  ;;  %4070 = vmatpush3.msra.mxu0 %v734_v60 }
 0x63c   :  { %4079 = vmatprep.subr.mxu0 %v4572_v20 }
 0x63d   :  { %v721_v2 = vmul.f32 1.442695, %v718_v63 }
 0x63e   :  { %v810_v4 = vpop.permute.xlu1 %809 }
 0x63f   :  { %4410 = vpow2.f32 %v721_v2  ;;  %4075 = vmatpush3.msra.mxu1 %v810_v4 }
 0x640   :  { %4084 = vmatprep.subr.mxu1 %v4572_v20 }
 0x642   :  { %v899_v12 = vpop.permute.xlu1 %898 }
 0x645   :  { %v4409_v5 = vpop.eup %4408 }
 0x646   :  { %v723_v7 = vsel %vm225_vm6, %v4409_v5, 0.0  ;;  %v977_v16 = vpop.permute.xlu1 %976 }
 0x647   :  { %724 = vadd.xlane.f32.xlu0 %v723_v7 }
 0x649   :  { %v4411_v8 = vpop.eup %4410 }
 0x64a   :  { %v726_v9 = vsel %vm225_vm6, %v4411_v8, 0.0  ;;  %v975_v19 = vpop.permute.xlu1 %974 }
 0x64b   :  { %727 = vadd.xlane.f32.xlu0 %v726_v9 }
 0x661   :  { %896 = vrot.lane.b32.xlu0 %v4717_v59, %s4580_s21 }
 0x6d4   :  { %v725_v10 = vpop.xlane.xlu0 %724 }
 0x6d5   :  { %4412 = vrcp.f32 %v725_v10 }
 0x6d8   :  { %v728_v11 = vpop.xlane.xlu0 %727 }
 0x6d9   :  { %4414 = vrcp.f32 %v728_v11 }
 0x6dc   :  { %v897_v18 = vpop.permute.xlu0 %896 }
 0x6df   :  { %v4413_v13 = vpop.eup %4412 }
 0x6e0   :  { %v731_v14 = vmul.f32 %v4413_v13, %v4409_v5 }
 0x6e2   :  { %4072 = vmatmul.mubr.msk.f32.vlgmr.msra.gmra.mrb[4].mxu0 %vm225_vm6, %v731_v14 }
 0x6e3   :  { %v4415_v15 = vpop.eup %4414  ;;  %4080 = vmatpush3.xpose.msk.msra.mxu0 %vm225_vm6, %v899_v12  ;;  %4081 = vmatprep.mubr.msk.f32.mxu0 %vm4573_vm5, %v4572_v20 }
 0x6e4   :  { %v732_v17 = vmul.f32 %v4415_v15, %v4411_v8  ;;  %4089 = vmatprep.subr.mxu0 %v4572_v20 }
 0x6e6   :  { %4077 = vmatmul.mubr.msk.f32.vlgmr.msra.gmra.mrb[10].mxu1 %vm225_vm6, %v732_v17  ;;  %4082 = vmatmul.mubr.msk.f32.vlgmr.msra.gmra.mrb[6].mxu0 %vm225_vm6, %v897_v18 }
 0x6e7   :  { %4085 = vmatpush3.xpose.msk.msra.mxu1 %vm225_vm6, %v977_v16  ;;  %4086 = vmatprep.mubr.msk.f32.mxu1 %vm4573_vm5, %v4572_v20 }
 0x6e8   :  { %4094 = vmatprep.subr.mxu1 %v4572_v20  ;;  %4091 = vmatprep.mubr.msk.f32.mxu0 %vm4573_vm5, %v4572_v20 }
 0x6ea   :  { %4087 = vmatmul.mubr.msk.f32.vlgmr.msra.gmra.mrb[12].mxu1 %vm225_vm6, %v975_v19 }
 0x6eb   :  { %4096 = vmatprep.mubr.msk.f32.mxu1 %vm4573_vm5, %v4572_v20 }
 0x7b5   :  { %v4821_v21 = vpop.f32.mrb[4].mxu0 }
 0x7b6   :  { %v4073_v22 = vpop.f32.mrb[5].mxu0 }
 0x7b9   :  { %v4823_v23 = vpop.f32.mrb[10].mxu1  ;;  %v970_v24 = vpop.f32.mrb[6].mxu0 }
 0x7ba   :  { %v971_v25 = vadd.f32 %v970_v24, %v4741_v3  ;;  %v4078_v26 = vpop.f32.mrb[11].mxu1  ;;  %v4083_v27 = vpop.f32.mrb[7].mxu0 }
 0x7bc   :  { %v1052_v28 = vsel %vm225_vm6, %v971_v25, -inf }
 0x7bd   :  { %1053 = vmax.xlane.f32.xlu0 %v1052_v28  ;;  %v1048_v29 = vpop.f32.mrb[12].mxu1 }
 0x7be   :  { %v1049_v30 = vadd.f32 %v1048_v29, %v4745_v6  ;;  %v4088_v32 = vpop.f32.mrb[13].mxu1 }
 0x7c0   :  { %v1055_v33 = vsel %vm225_vm6, %v1049_v30, -inf }
 0x7c1   :  { %1056 = vmax.xlane.f32.xlu1 %v1055_v33 }
 0x7d2   :  { %1150 = vrot.lane.b32.xlu1 %v4707_v55, %s4581_s22 }
 0x7d3   :  { %1074 = vrot.lane.b32.xlu0 %v4709_v57, %s4581_s22 }
 0x7d6   :  { %1239 = vrot.lane.b32.xlu1 %v4709_v57, %s4582_s23 }
 0x7da   :  { %1317 = vrot.lane.b32.xlu1 %v4707_v55, %s4582_s23 }
 0x7de   :  { %1315 = vrot.lane.b32.xlu1 %v4726_v61, %s4583_s24 }
 0x84a   :  { %v1054_v34 = vpop.xlane.xlu0 %1053 }
 0x84b   :  { %v1058_v35 = vsub.f32 %v971_v25, %v1054_v34 }
 0x84d   :  { %v1060_v36 = vmul.f32 1.442695, %v1058_v35 }
 0x84e   :  { %v1075_v38 = vpop.permute.xlu0 %1074  ;;  %v1057_v40 = vpop.xlane.xlu1 %1056 }
 0x84f   :  { %4416 = vpow2.f32 %v1060_v36  ;;  %v1059_v41 = vsub.f32 %v1049_v30, %v1057_v40  ;;  %4090 = vmatpush3.msra.mxu0 %v1075_v38  ;;  %v1581_v38 = vld [vmem:[%s5301_s3 + $0x8] sm:$0xff] }
 0x850   :  { %4099 = vmatprep.subr.mxu0 %v4572_v20 }
 0x851   :  { %v1062_v43 = vmul.f32 1.442695, %v1059_v41  ;;  %v1582_v41 = vld [vmem:[%s5301_s3 + $0x10] sm:$0xff] }
 0x852   :  { %v1151_v44 = vpop.permute.xlu1 %1150 }
 0x853   :  { %4418 = vpow2.f32 %v1062_v43  ;;  %4095 = vmatpush3.msra.mxu1 %v1151_v44  ;;  %v1583_v43 = vld [vmem:[%s5301_s3 + $0x18] sm:$0xff] }
 0x854   :  { %4104 = vmatprep.subr.mxu1 %v4572_v20  ;;  %v4304_v44 = vpack.c.bf16 %v1583_v43, %v1582_v41 }
 0x856   :  { %v1240_v50 = vpop.permute.xlu1 %1239 }
 0x859   :  { %v4417_v45 = vpop.eup %4416 }
 0x85a   :  { %v1064_v46 = vsel %vm225_vm6, %v4417_v45, 0.0  ;;  %v1318_v56 = vpop.permute.xlu1 %1317 }
 0x85b   :  { %1065 = vadd.xlane.f32.xlu0 %v1064_v46 }
 0x85d   :  { %v4419_v61 = vpop.eup %4418 }
 0x85e   :  { %v1067_v47 = vsel %vm225_vm6, %v4419_v61, 0.0  ;;  %v1316_v60 = vpop.permute.xlu1 %1315 }
 0x85f   :  { %1068 = vadd.xlane.f32.xlu0 %v1067_v47 }
 0x875   :  { %1237 = vrot.lane.b32.xlu0 %v4717_v59, %s4583_s24 }
 0x8e8   :  { %v1066_v48 = vpop.xlane.xlu0 %1065 }
 0x8e9   :  { %4420 = vrcp.f32 %v1066_v48 }
 0x8ec   :  { %v1069_v49 = vpop.xlane.xlu0 %1068 }
 0x8ed   :  { %4422 = vrcp.f32 %v1069_v49 }
 0x8f0   :  { %v1238_v59 = vpop.permute.xlu0 %1237 }
 0x8f3   :  { %v4421_v51 = vpop.eup %4420 }
 0x8f4   :  { %v1072_v53 = vmul.f32 %v4421_v51, %v4417_v45 }
 0x8f6   :  { %4092 = vmatmul.mubr.msk.f32.vlgmr.msra.gmra.mrb[8].mxu0 %vm225_vm6, %v1072_v53  ;;  %v4902_v53 = vsub.s32 1, %v4684_v31 }
 0x8f7   :  { %v4423_v54 = vpop.eup %4422  ;;  %4100 = vmatpush3.xpose.msk.msra.mxu0 %vm225_vm6, %v1240_v50  ;;  %4101 = vmatprep.mubr.msk.f32.mxu0 %vm4573_vm5, %v4572_v20 }
 0x8f8   :  { %v1073_v58 = vmul.f32 %v4423_v54, %v4419_v61  ;;  %4109 = vmatprep.subr.mxu0 %v4572_v20  ;;  %v1670_v54 = vrot.slane %v4687_v39, %v4902_v53 }
 0x8fa   :  { %4097 = vmatmul.mubr.msk.f32.vlgmr.msra.gmra.mrb[14].mxu1 %vm225_vm6, %v1073_v58  ;;  %4102 = vmatmul.mubr.msk.f32.vlgmr.msra.gmra.mrb[10].mxu0 %vm225_vm6, %v1238_v59 }
 0x8fb   :  { %4105 = vmatpush3.xpose.msk.msra.mxu1 %vm225_vm6, %v1318_v56  ;;  %4106 = vmatprep.mubr.msk.f32.mxu1 %vm4573_vm5, %v4572_v20 }
 0x8fc   :  { %4114 = vmatprep.subr.mxu1 %v4572_v20  ;;  %4111 = vmatprep.mubr.msk.f32.mxu0 %vm4573_vm5, %v4572_v20 }
 0x8fe   :  { %4107 = vmatmul.mubr.msk.f32.vlgmr.msra.gmra.mrb[16].mxu1 %vm225_vm6, %v1316_v60 }
 0x8ff   :  { %4116 = vmatprep.mubr.msk.f32.mxu1 %vm4573_vm5, %v4572_v20 }
 0x9c9   :  { %v1146_v62 = vpop.f32.mrb[8].mxu0 }
 0x9ca   :  { %v4093_v63 = vpop.f32.mrb[9].mxu0 }
 0x9cd   :  { %v1222_v2 = vpop.f32.mrb[14].mxu1  ;;  %v1311_v4 = vpop.f32.mrb[10].mxu0 }
 0x9ce   :  { %v1312_v5 = vadd.f32 %v1311_v4, %v4741_v3  ;;  %v4098_v7 = vpop.f32.mrb[15].mxu1  ;;  %v4103_v8 = vpop.f32.mrb[11].mxu0 }
 0x9d0   :  { %v1393_v9 = vsel %vm225_vm6, %v1312_v5, -inf }
 0x9d1   :  { %1394 = vmax.xlane.f32.xlu0 %v1393_v9  ;;  %v1389_v10 = vpop.f32.mrb[16].mxu1 }
 0x9d2   :  { %v1390_v11 = vadd.f32 %v1389_v10, %v4745_v6  ;;  %v4108_v12 = vpop.f32.mrb[17].mxu1 }
 0x9d4   :  { %v1396_v13 = vsel %vm225_vm6, %v1390_v11, -inf }
 0x9d5   :  { %1397 = vmax.xlane.f32.xlu1 %v1396_v13 }
 0x9e6   :  { %1491 = vrot.lane.b32.xlu1 %v4707_v55, %s4584_s0 }
 0x9ea   :  { %887 = vrot.lane.b32.xlu1 %v4821_v21, %s4570_s12 }
 0x9ee   :  { %889 = vrot.lane.b32.xlu1 %v4823_v23, %s4570_s12 }
 0x9f2   :  { %1230 = vrot.lane.b32.xlu1 %v1222_v2, %s4585_s25 }
 0xa5e   :  { %v1395_v14 = vpop.xlane.xlu0 %1394 }
 0xa5f   :  { %v1399_v15 = vsub.f32 %v1312_v5, %v1395_v14  ;;  %v1725_v14 = vld [vmem:[%s5302_s4] sm:$0xff] }
 0xa61   :  { %v1401_v16 = vmul.f32 1.442695, %v1399_v15  ;;  %v1726_v15 = vld [vmem:[%s5302_s4 + $0x8] sm:$0xff] }
 0xa62   :  { %v1398_v17 = vpop.xlane.xlu1 %1397 }
 0xa63   :  { %4424 = vpow2.f32 %v1401_v16  ;;  %v1400_v18 = vsub.f32 %v1390_v11, %v1398_v17  ;;  %v1727_v16 = vld [vmem:[%s5302_s4 + $0x10] sm:$0xff]  ;;  %v4308_v17 = vpack.c.bf16 %v1726_v15, %v1725_v14  ;;  %v1910_v15 = vsub.s32 7, %v4684_v31 }
 0xa65   :  { %v1403_v19 = vmul.f32 1.442695, %v1400_v18  ;;  %v1728_v18 = vld [vmem:[%s5302_s4 + $0x18] sm:$0xff] }
 0xa66   :  { %v1492_v22 = vpop.permute.xlu1 %1491 }
 0xa67   :  { %4426 = vpow2.f32 %v1403_v19  ;;  %4115 = vmatpush3.msra.mxu1 %v1492_v22  ;;  %v4312_v19 = vpack.c.bf16 %v1728_v18, %v1727_v16  ;;  %v1816_v22 = vld [vmem:[%s5303_s5] sm:$0xff]  ;;  %v1911_v16 = vrot.slane %v4687_v39, %v1910_v15 }
 0xa68   :  { %4309 = vmatprep.subr.bf16.mxu1 %v4308_v17 }
 0xa6a   :  { %v888_v55 = vpop.permute.xlu1 %887 }
 0xa6b   :  { %894 = vst.msk [vmem:[#allocation2] sm:$0xff] %vm893_vm9, %v888_v55  ;;  %v1817_v55 = vld [vmem:[%s5303_s5 + $0x8] sm:$0xff] }
 0xa6d   :  { %v4425_v21 = vpop.eup %4424 }
 0xa6e   :  { %v890_v24 = vpop.permute.xlu1 %889  ;;  %v1405_v23 = vsel %vm225_vm6, %v4425_v21, 0.0 }
 0xa6f   :  { %895 = vst.msk [vmem:[#allocation2 + $0x8] sm:$0xff] %vm893_vm9, %v890_v24  ;;  %1406 = vadd.xlane.f32.xlu0 %v1405_v23  ;;  %v4316_v24 = vpack.c.bf16 %v1817_v55, %v1816_v22  ;;  %v1819_v23 = vld [vmem:[%s5303_s5 + $0x18] sm:$0xff] }
 0xa71   :  { %v4427_v25 = vpop.eup %4426 }
 0xa72   :  { %v1231_v26 = vpop.permute.xlu1 %1230  ;;  %v1408_v27 = vsel %vm225_vm6, %v4427_v25, 0.0 }
 0xa73   :  { %1236 = vst.msk [vmem:[#allocation2 + $0x8] sm:$0xff] %vm1234_vm10, %v1231_v26  ;;  %1409 = vadd.xlane.f32.xlu0 %v1408_v27  ;;  %v1820_v26 = vld [vmem:[%s5303_s5 + $0x20] sm:$0xff]  ;;  %v1821_v27 = vld [vmem:[%s5303_s5 + $0x28] sm:$0xff] }
 0xa89   :  { %1415 = vrot.lane.b32.xlu0 %v4709_v57, %s4584_s0  ;;  %v1580_v57 = vld [vmem:[%s5301_s3] sm:$0xff] }
 0xa8a   :  { %v4300_v40 = vpack.c.bf16 %v1581_v38, %v1580_v57 }
 0xa8d   :  { %1228 = vrot.lane.b32.xlu0 %v1146_v62, %s4585_s25 }
 0xafc   :  { %v1407_v28 = vpop.xlane.xlu0 %1406 }
 0xafd   :  { %4428 = vrcp.f32 %v1407_v28  ;;  %v4324_v28 = vpack.c.bf16 %v1821_v27, %v1820_v26 }
 0xb00   :  { %v1410_v29 = vpop.xlane.xlu0 %1409 }
 0xb01   :  { %4430 = vrcp.f32 %v1410_v29 }
 0xb04   :  { %v1416_v30 = vpop.permute.xlu0 %1415 }
 0xb05   :  { %4110 = vmatpush3.msra.mxu0 %v1416_v30 }
 0xb06   :  { %4301 = vmatprep.subr.bf16.mxu0 %v4300_v40 }
 0xb07   :  { %v4429_v32 = vpop.eup %4428 }
 0xb08   :  { %v1413_v33 = vmul.f32 %v4429_v32, %v4425_v21  ;;  %v1229_v34 = vpop.permute.xlu0 %1228  ;;  %v1818_v21 = vld [vmem:[%s5303_s5 + $0x10] sm:$0xff] }
 0xb09   :  { %1235 = vst.msk [vmem:[#allocation2] sm:$0xff] %vm1234_vm10, %v1229_v34 }
 0xb0a   :  { %4112 = vmatmul.mubr.msk.f32.vlgmr.msra.gmra.mrb[12].mxu0 %vm225_vm6, %v1413_v33 }
 0xb0b   :  { %v4431_v35 = vpop.eup %4430  ;;  %4303 = vmatpush3.bf16.msra.mxu0 %v4300_v40 }
 0xb0c   :  { %v1414_v36 = vmul.f32 %v4431_v35, %v4427_v25  ;;  %4305 = vmatprep.subr.bf16.mxu0 %v4304_v44  ;;  %v4320_v25 = vpack.c.bf16 %v1819_v23, %v1818_v21 }
 0xb0e   :  { %4117 = vmatmul.mubr.msk.f32.vlgmr.msra.gmra.mrb[18].mxu1 %vm225_vm6, %v1414_v36 }
 0xb0f   :  { %4307 = vmatpush3.bf16.msra.mxu0 %v4304_v44  ;;  %4311 = vmatpush3.bf16.msra.mxu1 %v4308_v17 }
 0xb10   :  { %4313 = vmatprep.subr.bf16.mxu1 %v4312_v19  ;;  %4317 = vmatprep.subr.bf16.mxu0 %v4316_v24 }
 0xb13   :  { %4315 = vmatpush3.bf16.msra.mxu1 %v4312_v19 }
 0xbdd   :  { %v1487_v45 = vpop.f32.mrb[12].mxu0 }
 0xbde   :  { %1569 = vrot.lane.b32.xlu0 %v1487_v45, %s4586_s13  ;;  %v4113_v46 = vpop.f32.mrb[13].mxu0 }
 0xbdf   :  { %v1709_v46 = vsub.s32 4, %v4684_v31 }
 0xbe1   :  { %v1563_v61 = vpop.f32.mrb[18].mxu1 }
 0xbe2   :  { %1571 = vrot.lane.b32.xlu1 %v1563_v61, %s4586_s13  ;;  %v4118_v47 = vpop.f32.mrb[19].mxu1 }
 0xc50   :  { %v1570_v48 = vpop.permute.xlu0 %1569 }
 0xc51   :  { %1576 = vst.msk [vmem:[#allocation2] sm:$0xff] %vm1575_vm11, %v1570_v48  ;;  %v1710_v48 = vrot.slane %v4687_v39, %v1709_v46 }
 0xc54   :  { %v1572_v49 = vpop.permute.xlu1 %1571 }
 0xc55   :  { %1577 = vst.msk [vmem:[#allocation2 + $0x8] sm:$0xff] %vm1575_vm11, %v1572_v49  ;;  %v1721_v49 = vsub.s32 5, %v4684_v31 }
 0xc58   :  { %v1578_v50 = vld [vmem:[#allocation2] sm:$0xff] }
 0xc59   :  { %4127 = vmatprep.mubr.msk.f32.mxu0 %vm76_vm0, %v1578_v50 }
 0xc5c   :  { %v1579_v51 = vld [vmem:[#allocation2 + $0x8] sm:$0xff] }
 0xc5d   :  { %4128 = vmatmul.mubr.msk.f32.vlgmr.msra.gmra.mrb[14].mxu0 %vm76_vm0, %v1579_v51  ;;  %v1722_v51 = vrot.slane %v4687_v39, %v1721_v49 }
 0xc5e   :  { %4319 = vmatpush3.bf16.msra.mxu0 %v4316_v24 }
 0xc5f   :  { %4321 = vmatprep.subr.bf16.mxu0 %v4320_v25 }
 0xc62   :  { %4323 = vmatpush3.bf16.msra.mxu0 %v4320_v25 }
 0xc63   :  { %4325 = vmatprep.subr.bf16.mxu0 %v4324_v28 }
 0xc66   :  { %4327 = vmatpush3.bf16.msra.mxu0 %v4324_v28 }
 0xd30   :  { %v4129_v56 = vpop.f32.mrb[14].mxu0 }
 0xd31   :  { %v1666_v58 = vadd.f32 %v4129_v56, %v4660_v1  ;;  %v1656_v59 = vpop.f32.mrb[15].mxu0 }
 0xd32   :  { %v1665_v60 = vadd.f32 %v1656_v59, %v4658_v0 }
 0xd33   :  { %v4908_v62 = vadd.f32 %v1670_v54, %v1666_v58 }
 0xd34   :  { %v4910_v63 = vadd.f32 %v1670_v54, %v1665_v60 }
 0xd35   :  { %v1676_v2 = vsel %vm76_vm0, %v4908_v62, 0.0 }
 0xd36   :  { %1677 = vadd.xlane.f32.xlu1 %v1676_v2  ;;  %v1673_v4 = vsel %vm76_vm0, %v4910_v63, 0.0 }
 0xd37   :  { %1674 = vadd.xlane.f32.xlu0 %v1673_v4 }
 0xdc3   :  { %v1678_v5 = vpop.xlane.xlu1 %1677 }
 0xdc4   :  { %v1680_v7 = vmul.f32 0.03125, %v1678_v5  ;;  %v1675_v8 = vpop.xlane.xlu0 %1674  ;;  %v1822_v5 = vld [vmem:[%s5303_s5 + $0x30] sm:$0xff] }
 0xdc5   :  { %v1679_v9 = vmul.f32 0.03125, %v1675_v8 }
 0xdc6   :  { %v4917_v1 = vsub.f32 %v4908_v62, %v1680_v7  ;;  %v1823_v7 = vld [vmem:[%s5303_s5 + $0x38] sm:$0xff] }
 0xdc7   :  { %v1681_v0 = vsub.f32 %v4910_v63, %v1679_v9  ;;  %v4328_v8 = vpack.c.bf16 %v1823_v7, %v1822_v5  ;;  %v1731_v9 = vsub.s32 6, %v4684_v31 }
 0xdc8   :  { %v1684_v12 = vmul.f32 %v4917_v1, %v4917_v1  ;;  %v1712_v58 = vmul.f32 %v1710_v48, %v4917_v1 }
 0xdc9   :  { %v1683_v10 = vmul.f32 %v1681_v0, %v1681_v0  ;;  %v1711_v50 = vmul.f32 %v1710_v48, %v1681_v0  ;;  %4329 = vmatprep.subr.bf16.mxu0 %v4328_v8  ;;  %v1732_v1 = vrot.slane %v4687_v39, %v1731_v9 }
 0xdca   :  { %v1688_v13 = vsel %vm76_vm0, %v1684_v12, 0.0  ;;  %4331 = vmatpush3.bf16.msra.mxu0 %v4328_v8 }
 0xdcb   :  { %v1685_v11 = vsel %vm76_vm0, %v1683_v10, 0.0  ;;  %4181 = vmatprep.subr.mxu0 %v4572_v20 }
 0xdcc   :  { %1686 = vadd.xlane.f32.xlu0 %v1685_v11 }
 0xdd0   :  { %1689 = vadd.xlane.f32.xlu0 %v1688_v13 }
 0xe59   :  { %v1687_v29 = vpop.xlane.xlu0 %1686 }
 0xe5a   :  { %v1691_v30 = vmul.f32 0.032258064, %v1687_v29 }
 0xe5c   :  { %4432 = vrsqrt.f32 %v1691_v30  ;;  %vm1695_vm12 = vcmp.eq.f32.partialorder %v1691_v30, inf  ;;  %v1698_v36 = vand.u32 2147483648, %v1691_v30  ;;  %vm1697_vm13 = vcmp.eq.f32.partialorder %v1691_v30, 0.0 }
 0xe5d   :  { %v1690_v32 = vpop.xlane.xlu0 %1689 }
 0xe5e   :  { %v1692_v33 = vmul.f32 0.032258064, %v1690_v32 }
 0xe60   :  { %4434 = vrsqrt.f32 %v1692_v33  ;;  %vm1702_vm14 = vcmp.eq.f32.partialorder %v1692_v33, inf  ;;  %v1705_v44 = vand.u32 2147483648, %v1692_v33  ;;  %vm1704_vm15 = vcmp.eq.f32.partialorder %v1692_v33, 0.0 }
 0xe66   :  { %v4433_v34 = vpop.eup %4432 }
 0xe67   :  { %v1694_v35 = vmul.f32 %v4433_v34, %v1691_v30  ;;  %v3857_v34 = vld [vmem:[%s5300_s2 + $0x28] sm:$0xff] }
 0xe69   :  { %v1696_v57 = vsel %vm1695_vm12, %v1691_v30, %v1694_v35  ;;  %v3858_v35 = vld [vmem:[%s5300_s2 + $0x30] sm:$0xff] }
 0xe6a   :  { %v4435_v38 = vpop.eup %4434  ;;  %v1699_v40 = vsel %vm1697_vm13, %v1698_v36, %v1696_v57  ;;  %v3859_v57 = vld [vmem:[%s5300_s2 + $0x38] sm:$0xff] }
 0xe6b   :  { %v1701_v41 = vmul.f32 %v4435_v38, %v1692_v33  ;;  %v1713_v43 = vadd.f32 1e-06, %v1699_v40  ;;  %v4336_v38 = vpack.c.bf16 %v3859_v57, %v3858_v35 }
 0xe6d   :  { %v1703_v45 = vsel %vm1702_vm14, %v1692_v33, %v1701_v41  ;;  %4436 = vrcp.f32 %v1713_v43  ;;  %v3856_v33 = vld [vmem:[%s5300_s2 + $0x20] sm:$0xff] }
 0xe6e   :  { %v1706_v61 = vsel %vm1704_vm15, %v1705_v44, %v1703_v45  ;;  %v4332_v36 = vpack.c.bf16 %v3857_v34, %v3856_v33 }
 0xe6f   :  { %v1714_v47 = vadd.f32 1e-06, %v1706_v61 }
 0xe70   :  { %4333 = vmatprep.subr.bf16.mxu1 %v4332_v36 }
 0xe71   :  { %4438 = vrcp.f32 %v1714_v47 }
 0xe77   :  { %v4437_v54 = vpop.eup %4436 }
 0xe78   :  { %v1716_v56 = vmul.f32 %v4437_v54, %v1711_v50 }
 0xe7a   :  { %v1723_v59 = vadd.f32 %v1722_v51, %v1716_v56 }
 0xe7b   :  { %v4439_v60 = vpop.eup %4438 }
 0xe7c   :  { %v1718_v2 = vmul.f32 %v4439_v60, %v1712_v58  ;;  %4138 = vmatprep.mubr.msk.f32.mxu1 %vm76_vm0, %v1723_v59 }
 0xe7e   :  { %v1724_v4 = vadd.f32 %v1722_v51, %v1718_v2 }
 0xe80   :  { %4139 = vmatmul.mubr.msk.f32.vlgmr.msra.gmra.mrb[20].mxu1 %vm76_vm0, %v1724_v4  ;;  %v5011_v4 = vld [vmem:[#allocation6 + $0x8] sm:$0xff] }
 0xe81   :  { %4335 = vmatpush3.bf16.msra.mxu1 %v4332_v36  ;;  %v1953_v5 = vrot.slane %v5011_v4, %v115_v37  ;;  %v1965_v7 = vrot.slane %v5011_v4, %v127_v42  ;;  %v1976_v37 = vrot.slane %v5011_v4, %v4703_v52 }
 0xe82   :  { %4337 = vmatprep.subr.bf16.mxu1 %v4336_v38 }
 0xe85   :  { %4339 = vmatpush3.bf16.msra.mxu1 %v4336_v38 }
 0xe86   :  { %4171 = vmatprep.subr.mxu1 %v4572_v20 }
 0xf53   :  { %v4140_v0 = vpop.f32.mrb[20].mxu1 }
 0xf54   :  { %v1811_v10 = vadd.f32 %v4140_v0, %v1732_v1  ;;  %v1805_v11 = vpop.f32.mrb[21].mxu1 }
 0xf55   :  { %v1806_v12 = vadd.f32 %v1805_v11, %v1732_v1 }
 0xf56   :  { %v1815_v14 = vmax.f32 %v1811_v10, 0.0 }
 0xf57   :  { %v1814_v13 = vmax.f32 %v1806_v12, 0.0 }
 0xf59   :  { %4157 = vmatprep.mubr.msk.f32.mxu0 %vm1824_vm1, %v1814_v13 }
 0xf5a   :  { %4158 = vmatmul.mubr.msk.f32.vlgmr.msra.gmra.mrb[16].mxu0 %vm1824_vm1, %v1815_v14 }
 0xf5b   :  { %4183 = vmatprep.mubr.msk.f32.mxu0 %vm4573_vm5, %v4572_v20 }
0x102d   :  { %v4159_v17 = vpop.f32.mrb[16].mxu0 }
0x102e   :  { %v1907_v18 = vadd.f32 %v4159_v17, %v4908_v62  ;;  %v1897_v19 = vpop.f32.mrb[17].mxu0 }
0x102f   :  { %v1906_v22 = vadd.f32 %v1897_v19, %v4910_v63 }
0x1030   :  { %v4986_v55 = vadd.f32 %v1911_v16, %v1907_v18 }
0x1031   :  { %v4988_v21 = vadd.f32 %v1911_v16, %v1906_v22 }
0x1032   :  { %v1919_v24 = vsel %vm76_vm0, %v4986_v55, 0.0 }
0x1033   :  { %1920 = vadd.xlane.f32.xlu1 %v1919_v24  ;;  %v1916_v23 = vsel %vm76_vm0, %v4988_v21, 0.0 }
0x1034   :  { %1917 = vadd.xlane.f32.xlu0 %v1916_v23 }
0x10c0   :  { %v1921_v25 = vpop.xlane.xlu1 %1920 }
0x10c1   :  { %v1923_v39 = vmul.f32 0.03125, %v1921_v25  ;;  %v1918_v26 = vpop.xlane.xlu0 %1917 }
0x10c2   :  { %v1922_v27 = vmul.f32 0.03125, %v1918_v26 }
0x10c3   :  { %v1925_v62 = vsub.f32 %v4986_v55, %v1923_v39 }
0x10c4   :  { %v1924_v63 = vsub.f32 %v4988_v21, %v1922_v27 }
0x10c5   :  { %v1927_v28 = vmul.f32 %v1925_v62, %v1925_v62  ;;  %v1955_v8 = vmul.f32 %v1953_v5, %v1925_v62 }
0x10c6   :  { %v1926_v29 = vmul.f32 %v1924_v63, %v1924_v63  ;;  %v1954_v0 = vmul.f32 %v1953_v5, %v1924_v63 }
0x10c7   :  { %v1931_v30 = vsel %vm76_vm0, %v1927_v28, 0.0 }
0x10c8   :  { %1932 = vadd.xlane.f32.xlu1 %v1931_v30  ;;  %v1928_v32 = vsel %vm76_vm0, %v1926_v29, 0.0 }
0x10c9   :  { %1929 = vadd.xlane.f32.xlu0 %v1928_v32 }
0x1155   :  { %v1933_v40 = vpop.xlane.xlu1 %1932 }
0x1156   :  { %v1935_v41 = vmul.f32 0.032258064, %v1933_v40  ;;  %v1930_v43 = vpop.xlane.xlu0 %1929 }
0x1157   :  { %v1934_v44 = vmul.f32 0.032258064, %v1930_v43 }
0x1158   :  { %4440 = vrsqrt.f32 %v1935_v41  ;;  %vm1945_vm2 = vcmp.eq.f32.partialorder %v1935_v41, inf  ;;  %v1948_v48 = vand.u32 2147483648, %v1935_v41  ;;  %vm1947_vm3 = vcmp.eq.f32.partialorder %v1935_v41, 0.0 }
0x1159   :  { %4442 = vrsqrt.f32 %v1934_v44  ;;  %vm1938_vm4 = vcmp.eq.f32.partialorder %v1934_v44, inf  ;;  %v1941_v54 = vand.u32 2147483648, %v1934_v44  ;;  %vm1940_vm7 = vcmp.eq.f32.partialorder %v1934_v44, 0.0 }
0x1162   :  { %v4441_v45 = vpop.eup %4440 }
0x1163   :  { %v4443_v61 = vpop.eup %4442  ;;  %v1944_v47 = vmul.f32 %v4441_v45, %v1935_v41 }
0x1164   :  { %v1937_v50 = vmul.f32 %v4443_v61, %v1934_v44 }
0x1165   :  { %v1946_v51 = vsel %vm1945_vm2, %v1935_v41, %v1944_v47 }
0x1166   :  { %v1949_v56 = vsel %vm1947_vm3, %v1948_v48, %v1946_v51  ;;  %v1939_v58 = vsel %vm1938_vm4, %v1934_v44, %v1937_v50 }
0x1167   :  { %v1957_v59 = vadd.f32 1e-06, %v1949_v56  ;;  %v1942_v60 = vsel %vm1940_vm7, %v1941_v54, %v1939_v58 }
0x1168   :  { %v1956_v2 = vadd.f32 1e-06, %v1942_v60 }
0x1169   :  { %4444 = vrcp.f32 %v1957_v59 }
0x116a   :  { %4446 = vrcp.f32 %v1956_v2 }
0x1173   :  { %v4445_v1 = vpop.eup %4444 }
0x1174   :  { %v4447_v10 = vpop.eup %4446  ;;  %v1961_v11 = vmul.f32 %v4445_v1, %v1955_v8 }
0x1175   :  { %v1959_v12 = vmul.f32 %v4447_v10, %v1954_v0 }
0x1176   :  { %v1967_v13 = vadd.f32 %v1965_v7, %v1961_v11 }
0x1177   :  { %v1966_v14 = vadd.f32 %v1965_v7, %v1959_v12 }
0x1179   :  { %4168 = vmatprep.mubr.msk.f32.mxu1 %vm76_vm0, %v1966_v14 }
0x117a   :  { %4169 = vmatmul.mubr.msk.f32.vlgmr.msra.gmra.mrb[22].mxu1 %vm76_vm0, %v1967_v13 }
0x117b   :  { %4173 = vmatprep.mubr.msk.f32.mxu1 %vm4573_vm5, %v4572_v20 }
0x124d   :  { %v4170_v16 = vpop.f32.mrb[22].mxu1 }
0x124e   :  { %v5025_v42 = vadd.f32 %v4170_v16, %v1976_v37  ;;  %v2049_v17 = vpop.f32.mrb[23].mxu1 }
0x124f   :  { %v5027_v18 = vadd.f32 %v2049_v17, %v1976_v37 }
0x1250   :  { %2139 = vrot.lane.b32.xlu1 %v5025_v42, %s4574_s10  ;;  %v5044_v23 = vmul.f32 0.35355338, %v5025_v42 }
0x1251   :  { %2061 = vrot.lane.b32.xlu0 %v5027_v18, %s4574_s10  ;;  %v5035_v22 = vmul.f32 0.35355338, %v5027_v18 }
0x12c2   :  { %v2140_v24 = vpop.permute.xlu1 %2139 }
0x12c3   :  { %v2062_v19 = vpop.permute.xlu0 %2061 }
0x12c4   :  { %4172 = vmatpush3.xpose.msk.msra.mxu1 %vm225_vm6, %v2062_v19 }
0x12c5   :  { %4176 = vmatprep.subr.mxu1 %v4572_v20 }
0x12c7   :  { %4174 = vmatmul.mubr.msk.f32.vlgmr.msra.gmra.mrb[24].mxu1 %vm225_vm6, %v5035_v22 }
0x12c8   :  { %4177 = vmatpush3.xpose.msk.msra.mxu1 %vm225_vm6, %v2140_v24  ;;  %4178 = vmatprep.mubr.msk.f32.mxu1 %vm4573_vm5, %v4572_v20 }
0x12c9   :  { %4186 = vmatprep.subr.mxu1 %v4572_v20 }
0x12cb   :  { %4179 = vmatmul.mubr.msk.f32.vlgmr.msra.gmra.mrb[26].mxu1 %vm225_vm6, %v5044_v23 }
0x12cc   :  { %4188 = vmatprep.mubr.msk.f32.mxu1 %vm4573_vm5, %v4572_v20 }
0x139a   :  { %v2134_v25 = vpop.f32.mrb[24].mxu1 }
0x139b   :  { %v2135_v39 = vadd.f32 %v2134_v25, %v4741_v3  ;;  %v4175_v26 = vpop.f32.mrb[25].mxu1 }
0x139d   :  { %v2216_v27 = vsel %vm225_vm6, %v2135_v39, -inf }
0x139e   :  { %2217 = vmax.xlane.f32.xlu1 %v2216_v27  ;;  %v2212_v62 = vpop.f32.mrb[26].mxu1 }
0x139f   :  { %v2213_v63 = vadd.f32 %v2212_v62, %v4745_v6  ;;  %v4180_v28 = vpop.f32.mrb[27].mxu1 }
0x13a1   :  { %v2219_v29 = vsel %vm225_vm6, %v2213_v63, -inf }
0x13a2   :  { %2220 = vmax.xlane.f32.xlu0 %v2219_v29 }
0x13af   :  { %2314 = vrot.lane.b32.xlu1 %v5025_v42, %s4575_s1 }
0x13b3   :  { %2394 = vrot.lane.b32.xlu1 %v5027_v18, %s4576_s17 }
0x13b7   :  { %2472 = vrot.lane.b32.xlu1 %v5025_v42, %s4576_s17 }
0x13b8   :  { %2238 = vrot.lane.b32.xlu0 %v5027_v18, %s4575_s1 }
0x142b   :  { %v2218_v30 = vpop.xlane.xlu1 %2217 }
0x142c   :  { %v2222_v32 = vsub.f32 %v2135_v39, %v2218_v30 }
0x142e   :  { %v2224_v33 = vmul.f32 1.442695, %v2222_v32 }
0x142f   :  { %v2315_v34 = vpop.permute.xlu1 %2314  ;;  %v2221_v35 = vpop.xlane.xlu0 %2220 }
0x1430   :  { %4448 = vpow2.f32 %v2224_v33  ;;  %v2223_v36 = vsub.f32 %v2213_v63, %v2221_v35  ;;  %4187 = vmatpush3.msra.mxu1 %v2315_v34 }
0x1431   :  { %4196 = vmatprep.subr.mxu1 %v4572_v20 }
0x1432   :  { %v2226_v57 = vmul.f32 1.442695, %v2223_v36 }
0x1433   :  { %v2239_v38 = vpop.permute.xlu0 %2238  ;;  %v2395_v45 = vpop.permute.xlu1 %2394 }
0x1434   :  { %4450 = vpow2.f32 %v2226_v57  ;;  %4182 = vmatpush3.msra.mxu0 %v2239_v38 }
0x1435   :  { %4191 = vmatprep.subr.mxu0 %v4572_v20 }
0x1437   :  { %v2473_v61 = vpop.permute.xlu1 %2472 }
0x143a   :  { %v4449_v40 = vpop.eup %4448 }
0x143b   :  { %v2228_v41 = vsel %vm225_vm6, %v4449_v40, 0.0 }
0x143c   :  { %2229 = vadd.xlane.f32.xlu0 %v2228_v41 }
0x143e   :  { %v4451_v43 = vpop.eup %4450 }
0x143f   :  { %v2231_v44 = vsel %vm225_vm6, %v4451_v43, 0.0 }
0x1440   :  { %2232 = vadd.xlane.f32.xlu1 %v2231_v44 }
0x1451   :  { %2470 = vrot.lane.b32.xlu1 %v5044_v23, %s4577_s18 }
0x1452   :  { %2392 = vrot.lane.b32.xlu0 %v5035_v22, %s4577_s18 }
0x14c9   :  { %v2230_v47 = vpop.xlane.xlu0 %2229 }
0x14ca   :  { %4452 = vrcp.f32 %v2230_v47 }
0x14cd   :  { %v2233_v48 = vpop.xlane.xlu1 %2232  ;;  %v2393_v58 = vpop.permute.xlu0 %2392 }
0x14ce   :  { %4454 = vrcp.f32 %v2233_v48 }
0x14d1   :  { %v2471_v59 = vpop.permute.xlu1 %2470 }
0x14d4   :  { %v4453_v50 = vpop.eup %4452 }
0x14d5   :  { %v2236_v51 = vmul.f32 %v4453_v50, %v4449_v40 }
0x14d7   :  { %4184 = vmatmul.mubr.msk.f32.vlgmr.msra.gmra.mrb[18].mxu0 %vm225_vm6, %v2236_v51 }
0x14d8   :  { %v4455_v54 = vpop.eup %4454  ;;  %4192 = vmatpush3.xpose.msk.msra.mxu0 %vm225_vm6, %v2395_v45  ;;  %4193 = vmatprep.mubr.msk.f32.mxu0 %vm4573_vm5, %v4572_v20 }
0x14d9   :  { %v2237_v56 = vmul.f32 %v4455_v54, %v4451_v43  ;;  %4201 = vmatprep.subr.mxu0 %v4572_v20 }
0x14db   :  { %4189 = vmatmul.mubr.msk.f32.vlgmr.msra.gmra.mrb[28].mxu1 %vm225_vm6, %v2237_v56  ;;  %4194 = vmatmul.mubr.msk.f32.vlgmr.msra.gmra.mrb[20].mxu0 %vm225_vm6, %v2393_v58 }
0x14dc   :  { %4197 = vmatpush3.xpose.msk.msra.mxu1 %vm225_vm6, %v2473_v61  ;;  %4198 = vmatprep.mubr.msk.f32.mxu1 %vm4573_vm5, %v4572_v20 }
0x14dd   :  { %4206 = vmatprep.subr.mxu1 %v4572_v20  ;;  %4203 = vmatprep.mubr.msk.f32.mxu0 %vm4573_vm5, %v4572_v20 }
0x14df   :  { %4199 = vmatmul.mubr.msk.f32.vlgmr.msra.gmra.mrb[30].mxu1 %vm225_vm6, %v2471_v59 }
0x14e0   :  { %4208 = vmatprep.mubr.msk.f32.mxu1 %vm4573_vm5, %v4572_v20 }
0x15aa   :  { %v2310_v60 = vpop.f32.mrb[18].mxu0 }
0x15ab   :  { %2390 = vst.msk [vmem:[#allocation2] sm:$0xff] %vm225_vm6, %v2310_v60  ;;  %v4185_v2 = vpop.f32.mrb[19].mxu0 }
0x15ae   :  { %v2386_v5 = vpop.f32.mrb[28].mxu1  ;;  %v2466_v7 = vpop.f32.mrb[20].mxu0 }
0x15af   :  { %2391 = vst.msk [vmem:[#allocation2 + $0x8] sm:$0xff] %vm225_vm6, %v2386_v5  ;;  %v2467_v8 = vadd.f32 %v2466_v7, %v4741_v3  ;;  %v4190_v1 = vpop.f32.mrb[29].mxu1  ;;  %v4195_v0 = vpop.f32.mrb[21].mxu0 }
0x15b1   :  { %v2548_v10 = vsel %vm225_vm6, %v2467_v8, -inf }
0x15b2   :  { %2549 = vmax.xlane.f32.xlu0 %v2548_v10  ;;  %v2544_v11 = vpop.f32.mrb[30].mxu1 }
0x15b3   :  { %v2545_v12 = vadd.f32 %v2544_v11, %v4745_v6  ;;  %v4200_v13 = vpop.f32.mrb[31].mxu1 }
0x15b5   :  { %v2551_v14 = vsel %vm225_vm6, %v2545_v12, -inf }
0x15b6   :  { %2552 = vmax.xlane.f32.xlu1 %v2551_v14 }
0x15c7   :  { %2646 = vrot.lane.b32.xlu1 %v5025_v42, %s4578_s19 }
0x15c8   :  { %2570 = vrot.lane.b32.xlu0 %v5027_v18, %s4578_s19 }
0x15cb   :  { %2734 = vrot.lane.b32.xlu1 %v5027_v18, %s4579_s20 }
0x15cf   :  { %2812 = vrot.lane.b32.xlu1 %v5025_v42, %s4579_s20 }
0x15d3   :  { %2810 = vrot.lane.b32.xlu1 %v5044_v23, %s4580_s21 }
0x163f   :  { %v2550_v37 = vpop.xlane.xlu0 %2549 }
0x1640   :  { %v2554_v16 = vsub.f32 %v2467_v8, %v2550_v37 }
0x1642   :  { %v2556_v17 = vmul.f32 1.442695, %v2554_v16 }
0x1643   :  { %v2571_v19 = vpop.permute.xlu0 %2570  ;;  %v2553_v24 = vpop.xlane.xlu1 %2552 }
0x1644   :  { %4456 = vpow2.f32 %v2556_v17  ;;  %v2555_v25 = vsub.f32 %v2545_v12, %v2553_v24  ;;  %4202 = vmatpush3.msra.mxu0 %v2571_v19 }
0x1645   :  { %4211 = vmatprep.subr.mxu0 %v4572_v20 }
0x1646   :  { %v2558_v39 = vmul.f32 1.442695, %v2555_v25 }
0x1647   :  { %v2647_v26 = vpop.permute.xlu1 %2646 }
0x1648   :  { %4458 = vpow2.f32 %v2558_v39  ;;  %4207 = vmatpush3.msra.mxu1 %v2647_v26 }
0x1649   :  { %4216 = vmatprep.subr.mxu1 %v4572_v20 }
0x164b   :  { %v2735_v32 = vpop.permute.xlu1 %2734 }
0x164e   :  { %v4457_v27 = vpop.eup %4456 }
0x164f   :  { %v2560_v62 = vsel %vm225_vm6, %v4457_v27, 0.0  ;;  %v2813_v36 = vpop.permute.xlu1 %2812 }
0x1650   :  { %2561 = vadd.xlane.f32.xlu0 %v2560_v62 }
0x1652   :  { %v4459_v63 = vpop.eup %4458 }
0x1653   :  { %v2563_v28 = vsel %vm225_vm6, %v4459_v63, 0.0  ;;  %v2811_v40 = vpop.permute.xlu1 %2810 }
0x1654   :  { %2564 = vadd.xlane.f32.xlu0 %v2563_v28 }
0x166a   :  { %2732 = vrot.lane.b32.xlu0 %v5035_v22, %s4580_s21 }
0x16dd   :  { %v2562_v29 = vpop.xlane.xlu0 %2561 }
0x16de   :  { %4460 = vrcp.f32 %v2562_v29 }
0x16e1   :  { %v2565_v30 = vpop.xlane.xlu0 %2564 }
0x16e2   :  { %4462 = vrcp.f32 %v2565_v30 }
0x16e5   :  { %v2733_v38 = vpop.permute.xlu0 %2732 }
0x16e8   :  { %v4461_v33 = vpop.eup %4460 }
0x16e9   :  { %v2568_v34 = vmul.f32 %v4461_v33, %v4457_v27 }
0x16eb   :  { %4204 = vmatmul.mubr.msk.f32.vlgmr.msra.gmra.mrb[22].mxu0 %vm225_vm6, %v2568_v34 }
0x16ec   :  { %v4463_v35 = vpop.eup %4462  ;;  %4212 = vmatpush3.xpose.msk.msra.mxu0 %vm225_vm6, %v2735_v32  ;;  %4213 = vmatprep.mubr.msk.f32.mxu0 %vm4573_vm5, %v4572_v20 }
0x16ed   :  { %v2569_v57 = vmul.f32 %v4463_v35, %v4459_v63  ;;  %4221 = vmatprep.subr.mxu0 %v4572_v20 }
0x16ef   :  { %4209 = vmatmul.mubr.msk.f32.vlgmr.msra.gmra.mrb[32].mxu1 %vm225_vm6, %v2569_v57  ;;  %4214 = vmatmul.mubr.msk.f32.vlgmr.msra.gmra.mrb[24].mxu0 %vm225_vm6, %v2733_v38 }
0x16f0   :  { %4217 = vmatpush3.xpose.msk.msra.mxu1 %vm225_vm6, %v2813_v36  ;;  %4218 = vmatprep.mubr.msk.f32.mxu1 %vm4573_vm5, %v4572_v20 }
0x16f1   :  { %4226 = vmatprep.subr.mxu1 %v4572_v20  ;;  %4223 = vmatprep.mubr.msk.f32.mxu0 %vm4573_vm5, %v4572_v20 }
0x16f3   :  { %4219 = vmatmul.mubr.msk.f32.vlgmr.msra.gmra.mrb[34].mxu1 %vm225_vm6, %v2811_v40 }
0x16f4   :  { %4228 = vmatprep.mubr.msk.f32.mxu1 %vm4573_vm5, %v4572_v20 }
0x17be   :  { %v5125_v41 = vpop.f32.mrb[22].mxu0 }
0x17bf   :  { %v4205_v43 = vpop.f32.mrb[23].mxu0 }
0x17c2   :  { %v5127_v44 = vpop.f32.mrb[32].mxu1  ;;  %v2806_v45 = vpop.f32.mrb[24].mxu0 }
0x17c3   :  { %v2807_v61 = vadd.f32 %v2806_v45, %v4741_v3  ;;  %v4210_v47 = vpop.f32.mrb[33].mxu1  ;;  %v4215_v48 = vpop.f32.mrb[25].mxu0 }
0x17c5   :  { %v2888_v50 = vsel %vm225_vm6, %v2807_v61, -inf }
0x17c6   :  { %2889 = vmax.xlane.f32.xlu0 %v2888_v50  ;;  %v2884_v51 = vpop.f32.mrb[34].mxu1 }
0x17c7   :  { %v2885_v54 = vadd.f32 %v2884_v51, %v4745_v6  ;;  %v4220_v56 = vpop.f32.mrb[35].mxu1 }
0x17c9   :  { %v2891_v58 = vsel %vm225_vm6, %v2885_v54, -inf }
0x17ca   :  { %2892 = vmax.xlane.f32.xlu1 %v2891_v58 }
0x17db   :  { %2986 = vrot.lane.b32.xlu1 %v5025_v42, %s4581_s22 }
0x17dc   :  { %2910 = vrot.lane.b32.xlu0 %v5027_v18, %s4581_s22 }
0x17df   :  { %3074 = vrot.lane.b32.xlu1 %v5027_v18, %s4582_s23 }
0x17e3   :  { %3152 = vrot.lane.b32.xlu1 %v5025_v42, %s4582_s23 }
0x17e7   :  { %3150 = vrot.lane.b32.xlu1 %v5044_v23, %s4583_s24 }
0x1853   :  { %v2890_v59 = vpop.xlane.xlu0 %2889 }
0x1854   :  { %v2894_v60 = vsub.f32 %v2807_v61, %v2890_v59 }
0x1856   :  { %v2896_v2 = vmul.f32 1.442695, %v2894_v60 }
0x1857   :  { %v2911_v5 = vpop.permute.xlu0 %2910  ;;  %v2893_v7 = vpop.xlane.xlu1 %2892 }
0x1858   :  { %4464 = vpow2.f32 %v2896_v2  ;;  %v2895_v8 = vsub.f32 %v2885_v54, %v2893_v7  ;;  %4222 = vmatpush3.msra.mxu0 %v2911_v5  ;;  %v3887_v5 = vld [vmem:[%s5301_s3 + $0x28] sm:$0xff] }
0x1859   :  { %4231 = vmatprep.subr.mxu0 %v4572_v20 }
0x185a   :  { %v2898_v1 = vmul.f32 1.442695, %v2895_v8  ;;  %v3888_v8 = vld [vmem:[%s5301_s3 + $0x30] sm:$0xff] }
0x185b   :  { %v2987_v0 = vpop.permute.xlu1 %2986 }
0x185c   :  { %4466 = vpow2.f32 %v2898_v1  ;;  %4227 = vmatpush3.msra.mxu1 %v2987_v0  ;;  %v3889_v1 = vld [vmem:[%s5301_s3 + $0x38] sm:$0xff] }
0x185d   :  { %4236 = vmatprep.subr.mxu1 %v4572_v20  ;;  %v4344_v0 = vpack.c.bf16 %v3889_v1, %v3888_v8 }
0x185f   :  { %v3075_v37 = vpop.permute.xlu1 %3074 }
0x1862   :  { %v4465_v10 = vpop.eup %4464 }
0x1863   :  { %v2900_v11 = vsel %vm225_vm6, %v4465_v10, 0.0  ;;  %v3153_v24 = vpop.permute.xlu1 %3152 }
0x1864   :  { %2901 = vadd.xlane.f32.xlu0 %v2900_v11 }
0x1866   :  { %v4467_v23 = vpop.eup %4466 }
0x1867   :  { %v2903_v12 = vsel %vm225_vm6, %v4467_v23, 0.0  ;;  %v3151_v39 = vpop.permute.xlu1 %3150 }
0x1868   :  { %2904 = vadd.xlane.f32.xlu0 %v2903_v12 }
0x187e   :  { %3072 = vrot.lane.b32.xlu0 %v5035_v22, %s4583_s24 }
0x18f1   :  { %v2902_v13 = vpop.xlane.xlu0 %2901 }
0x18f2   :  { %4468 = vrcp.f32 %v2902_v13 }
0x18f5   :  { %v2905_v14 = vpop.xlane.xlu0 %2904 }
0x18f6   :  { %4470 = vrcp.f32 %v2905_v14 }
0x18f9   :  { %v3073_v22 = vpop.permute.xlu0 %3072 }
0x18fc   :  { %v4469_v16 = vpop.eup %4468 }
0x18fd   :  { %v2908_v17 = vmul.f32 %v4469_v16, %v4465_v10 }
0x18ff   :  { %4224 = vmatmul.mubr.msk.f32.vlgmr.msra.gmra.mrb[26].mxu0 %vm225_vm6, %v2908_v17  ;;  %v3505_v17 = vrot.slane %v5011_v4, %v4902_v53 }
0x1900   :  { %v4471_v19 = vpop.eup %4470  ;;  %4232 = vmatpush3.xpose.msk.msra.mxu0 %vm225_vm6, %v3075_v37  ;;  %4233 = vmatprep.mubr.msk.f32.mxu0 %vm4573_vm5, %v4572_v20 }
0x1901   :  { %v2909_v25 = vmul.f32 %v4471_v19, %v4467_v23  ;;  %4241 = vmatprep.subr.mxu0 %v4572_v20 }
0x1903   :  { %4229 = vmatmul.mubr.msk.f32.vlgmr.msra.gmra.mrb[36].mxu1 %vm225_vm6, %v2909_v25  ;;  %4234 = vmatmul.mubr.msk.f32.vlgmr.msra.gmra.mrb[28].mxu0 %vm225_vm6, %v3073_v22 }
0x1904   :  { %4237 = vmatpush3.xpose.msk.msra.mxu1 %vm225_vm6, %v3153_v24  ;;  %4238 = vmatprep.mubr.msk.f32.mxu1 %vm4573_vm5, %v4572_v20 }
0x1905   :  { %4246 = vmatprep.subr.mxu1 %v4572_v20  ;;  %4243 = vmatprep.mubr.msk.f32.mxu0 %vm4573_vm5, %v4572_v20 }
0x1907   :  { %4239 = vmatmul.mubr.msk.f32.vlgmr.msra.gmra.mrb[38].mxu1 %vm225_vm6, %v3151_v39 }
0x1908   :  { %4248 = vmatprep.mubr.msk.f32.mxu1 %vm4573_vm5, %v4572_v20 }
0x19d2   :  { %v2982_v26 = vpop.f32.mrb[26].mxu0 }
0x19d3   :  { %v4225_v27 = vpop.f32.mrb[27].mxu0 }
0x19d6   :  { %v3058_v62 = vpop.f32.mrb[36].mxu1  ;;  %v3146_v63 = vpop.f32.mrb[28].mxu0 }
0x19d7   :  { %v3147_v28 = vadd.f32 %v3146_v63, %v4741_v3  ;;  %v4230_v29 = vpop.f32.mrb[37].mxu1  ;;  %v4235_v30 = vpop.f32.mrb[29].mxu0 }
0x19d9   :  { %v3228_v32 = vsel %vm225_vm6, %v3147_v28, -inf }
0x19da   :  { %3229 = vmax.xlane.f32.xlu0 %v3228_v32  ;;  %v3224_v33 = vpop.f32.mrb[38].mxu1 }
0x19db   :  { %v3225_v34 = vadd.f32 %v3224_v33, %v4745_v6  ;;  %v4240_v35 = vpop.f32.mrb[39].mxu1 }
0x19dd   :  { %v3231_v36 = vsel %vm225_vm6, %v3225_v34, -inf }
0x19de   :  { %3232 = vmax.xlane.f32.xlu1 %v3231_v36  ;;  %v3892_v36 = vld [vmem:[%s5302_s4 + $0x20] sm:$0xff] }
0x19ef   :  { %3326 = vrot.lane.b32.xlu1 %v5025_v42, %s4584_s0 }
0x19f3   :  { %2724 = vrot.lane.b32.xlu1 %v5125_v41, %s4570_s12 }
0x19f7   :  { %2726 = vrot.lane.b32.xlu1 %v5127_v44, %s4570_s12 }
0x19fb   :  { %3066 = vrot.lane.b32.xlu1 %v3058_v62, %s4585_s25 }
0x1a67   :  { %v3230_v20 = vpop.xlane.xlu0 %3229 }
0x1a68   :  { %v3234_v3 = vsub.f32 %v3147_v28, %v3230_v20  ;;  %v3893_v20 = vld [vmem:[%s5302_s4 + $0x28] sm:$0xff] }
0x1a6a   :  { %v3236_v57 = vmul.f32 1.442695, %v3234_v3  ;;  %v3894_v3 = vld [vmem:[%s5302_s4 + $0x30] sm:$0xff] }
0x1a6b   :  { %v3233_v38 = vpop.xlane.xlu1 %3232 }
0x1a6c   :  { %4472 = vpow2.f32 %v3236_v57  ;;  %v3235_v6 = vsub.f32 %v3225_v34, %v3233_v38  ;;  %v4348_v57 = vpack.c.bf16 %v3893_v20, %v3892_v36  ;;  %v3895_v38 = vld [vmem:[%s5302_s4 + $0x38] sm:$0xff] }
0x1a6e   :  { %v3238_v40 = vmul.f32 1.442695, %v3235_v6  ;;  %v4352_v6 = vpack.c.bf16 %v3895_v38, %v3894_v3 }
0x1a6f   :  { %v3327_v43 = vpop.permute.xlu1 %3326 }
0x1a70   :  { %4474 = vpow2.f32 %v3238_v40  ;;  %4247 = vmatpush3.msra.mxu1 %v3327_v43  ;;  %v3898_v40 = vld [vmem:[%s5303_s5 + $0x40] sm:$0xff]  ;;  %v3899_v43 = vld [vmem:[%s5303_s5 + $0x48] sm:$0xff] }
0x1a71   :  { %4349 = vmatprep.subr.bf16.mxu1 %v4348_v57 }
0x1a73   :  { %v2725_v45 = vpop.permute.xlu1 %2724 }
0x1a74   :  { %2730 = vst.msk [vmem:[#allocation2] sm:$0xff] %vm893_vm9, %v2725_v45  ;;  %v3900_v45 = vld [vmem:[%s5303_s5 + $0x50] sm:$0xff] }
0x1a76   :  { %v4473_v42 = vpop.eup %4472 }
0x1a77   :  { %v2727_v41 = vpop.permute.xlu1 %2726  ;;  %v3240_v61 = vsel %vm225_vm6, %v4473_v42, 0.0 }
0x1a78   :  { %2731 = vst.msk [vmem:[#allocation2 + $0x8] sm:$0xff] %vm893_vm9, %v2727_v41  ;;  %3241 = vadd.xlane.f32.xlu0 %v3240_v61  ;;  %v3901_v41 = vld [vmem:[%s5303_s5 + $0x58] sm:$0xff] }
0x1a79   :  { %v4360_v61 = vpack.c.bf16 %v3901_v41, %v3900_v45 }
0x1a7a   :  { %v4475_v44 = vpop.eup %4474 }
0x1a7b   :  { %v3067_v47 = vpop.permute.xlu1 %3066  ;;  %v3243_v48 = vsel %vm225_vm6, %v4475_v44, 0.0 }
0x1a7c   :  { %3071 = vst.msk [vmem:[#allocation2 + $0x8] sm:$0xff] %vm1234_vm10, %v3067_v47  ;;  %3244 = vadd.xlane.f32.xlu0 %v3243_v48  ;;  %v3903_v47 = vld [vmem:[%s5303_s5 + $0x68] sm:$0xff] }
0x1a92   :  { %3250 = vrot.lane.b32.xlu0 %v5027_v18, %s4584_s0  ;;  %v3886_v18 = vld [vmem:[%s5301_s3 + $0x20] sm:$0xff] }
0x1a93   :  { %v4340_v7 = vpack.c.bf16 %v3887_v5, %v3886_v18 }
0x1a96   :  { %3064 = vrot.lane.b32.xlu0 %v2982_v26, %s4585_s25 }
0x1b05   :  { %v3242_v50 = vpop.xlane.xlu0 %3241 }
0x1b06   :  { %4476 = vrcp.f32 %v3242_v50 }
0x1b09   :  { %v3245_v51 = vpop.xlane.xlu0 %3244 }
0x1b0a   :  { %4478 = vrcp.f32 %v3245_v51 }
0x1b0d   :  { %v3251_v54 = vpop.permute.xlu0 %3250 }
0x1b0e   :  { %4242 = vmatpush3.msra.mxu0 %v3251_v54 }
0x1b0f   :  { %4341 = vmatprep.subr.bf16.mxu0 %v4340_v7 }
0x1b10   :  { %v4477_v56 = vpop.eup %4476 }
0x1b11   :  { %v3248_v58 = vmul.f32 %v4477_v56, %v4473_v42  ;;  %v3065_v59 = vpop.permute.xlu0 %3064  ;;  %v4356_v42 = vpack.c.bf16 %v3899_v43, %v3898_v40 }
0x1b12   :  { %3070 = vst.msk [vmem:[#allocation2] sm:$0xff] %vm1234_vm10, %v3065_v59 }
0x1b13   :  { %4244 = vmatmul.mubr.msk.f32.vlgmr.msra.gmra.mrb[30].mxu0 %vm225_vm6, %v3248_v58 }
0x1b14   :  { %v4479_v60 = vpop.eup %4478  ;;  %4343 = vmatpush3.bf16.msra.mxu0 %v4340_v7 }
0x1b15   :  { %v3249_v2 = vmul.f32 %v4479_v60, %v4475_v44  ;;  %4345 = vmatprep.subr.bf16.mxu0 %v4344_v0  ;;  %v3902_v44 = vld [vmem:[%s5303_s5 + $0x60] sm:$0xff] }
0x1b16   :  { %v4364_v48 = vpack.c.bf16 %v3903_v47, %v3902_v44 }
0x1b17   :  { %4249 = vmatmul.mubr.msk.f32.vlgmr.msra.gmra.mrb[40].mxu1 %vm225_vm6, %v3249_v2 }
0x1b18   :  { %4347 = vmatpush3.bf16.msra.mxu0 %v4344_v0  ;;  %4351 = vmatpush3.bf16.msra.mxu1 %v4348_v57 }
0x1b19   :  { %4353 = vmatprep.subr.bf16.mxu1 %v4352_v6  ;;  %4357 = vmatprep.subr.bf16.mxu0 %v4356_v42 }
0x1b1c   :  { %4355 = vmatpush3.bf16.msra.mxu1 %v4352_v6 }
0x1be6   :  { %v3322_v10 = vpop.f32.mrb[30].mxu0 }
0x1be7   :  { %3404 = vrot.lane.b32.xlu0 %v3322_v10, %s4586_s13  ;;  %v4245_v11 = vpop.f32.mrb[31].mxu0 }
0x1bea   :  { %v3398_v23 = vpop.f32.mrb[40].mxu1 }
0x1beb   :  { %3406 = vrot.lane.b32.xlu1 %v3398_v23, %s4586_s13  ;;  %v4250_v12 = vpop.f32.mrb[41].mxu1  ;;  %v3545_v23 = vrot.slane %v5011_v4, %v1709_v46  ;;  %v3904_v46 = vld [vmem:[%s5303_s5 + $0x70] sm:$0xff] }
0x1c59   :  { %v3405_v13 = vpop.permute.xlu0 %3404 }
0x1c5a   :  { %3410 = vst.msk [vmem:[#allocation2] sm:$0xff] %vm1575_vm11, %v3405_v13  ;;  %v3557_v13 = vrot.slane %v5011_v4, %v1721_v49 }
0x1c5d   :  { %v3407_v14 = vpop.permute.xlu1 %3406 }
0x1c5e   :  { %3411 = vst.msk [vmem:[#allocation2 + $0x8] sm:$0xff] %vm1575_vm11, %v3407_v14 }
0x1c61   :  { %v3412_v37 = vld [vmem:[#allocation2] sm:$0xff] }
0x1c62   :  { %4259 = vmatprep.mubr.msk.f32.mxu0 %vm76_vm0, %v3412_v37 }
0x1c65   :  { %v3413_v16 = vld [vmem:[#allocation2 + $0x8] sm:$0xff] }
0x1c66   :  { %4260 = vmatmul.mubr.msk.f32.vlgmr.msra.gmra.mrb[32].mxu0 %vm76_vm0, %v3413_v16 }
0x1c67   :  { %4359 = vmatpush3.bf16.msra.mxu0 %v4356_v42 }
0x1c68   :  { %4361 = vmatprep.subr.bf16.mxu0 %v4360_v61 }
0x1c6b   :  { %4363 = vmatpush3.bf16.msra.mxu0 %v4360_v61 }
0x1c6c   :  { %4365 = vmatprep.subr.bf16.mxu0 %v4364_v48 }
0x1c6f   :  { %4367 = vmatpush3.bf16.msra.mxu0 %v4364_v48 }
0x1d39   :  { %v4261_v19 = vpop.f32.mrb[32].mxu0 }
0x1d3a   :  { %v3501_v24 = vadd.f32 %v4261_v19, %v4986_v55  ;;  %v3491_v25 = vpop.f32.mrb[33].mxu0 }
0x1d3b   :  { %v3500_v22 = vadd.f32 %v3491_v25, %v4988_v21 }
0x1d3c   :  { %v5209_v39 = vadd.f32 %v3505_v17, %v3501_v24 }
0x1d3d   :  { %v5211_v26 = vadd.f32 %v3505_v17, %v3500_v22  ;;  %v3905_v22 = vld [vmem:[%s5303_s5 + $0x78] sm:$0xff]  ;;  %s4587_s5 = smov [#allocation8]  }
0x1d3e   :  { %v3511_v27 = vsel %vm76_vm0, %v5209_v39, 0.0  ;;  %v4368_v49 = vpack.c.bf16 %v3905_v22, %v3904_v46  ;;  %s3811_s19 = sshll.u32 %s4587_s5, 4  ;;  %s3812_s19 = int_to_ptr.vmem [resolvable:$true] %s3811_s19 }
0x1d3f   :  { %3512 = vadd.xlane.f32.xlu1 %v3511_v27  ;;  %v3508_v62 = vsel %vm76_vm0, %v5211_v26, 0.0  ;;  %v3568_v27 = vrot.slane %v5011_v4, %v1731_v9  ;;  %s4540_s20 = scalar_lea.vmem %s3812_s19, 256  ;;  %p4545_p3 = scmp.lt.s32.totalorder %s3812_s19, %s3812_s19 }
0x1d40   :  { %3509 = vadd.xlane.f32.xlu0 %v3508_v62  ;;  %4369 = vmatprep.subr.bf16.mxu0 %v4368_v49  ;;  %p4541_p2 = scmp.ne.s32.totalorder %s3812_s19, %s4540_s20  ;;  %p4546_p4 = scmp.lt.s32.totalorder %s4540_s20, %s4540_s20 }
0x1d41   :  { %4371 = vmatpush3.bf16.msra.mxu0 %v4368_v49 }
0x1d42   :  { %p4547_p5 = por %p4546_p4, %p4545_p3 }
0x1d44   :  { %p4548_p6 = pnand %p4547_p5, %p4541_p2 }
0x1dcc   :  { %v3513_v63 = vpop.xlane.xlu1 %3512 }
0x1dcd   :  { %v3515_v28 = vmul.f32 0.03125, %v3513_v63  ;;  %v3510_v29 = vpop.xlane.xlu0 %3509 }
0x1dce   :  { %v3514_v30 = vmul.f32 0.03125, %v3510_v29 }
0x1dcf   :  { %v3517_v55 = vsub.f32 %v5209_v39, %v3515_v28 }
0x1dd0   :  { %v3516_v21 = vsub.f32 %v5211_v26, %v3514_v30 }
0x1dd1   :  { %v3519_v34 = vmul.f32 %v3517_v55, %v3517_v55  ;;  %v3547_v16 = vmul.f32 %v3545_v23, %v3517_v55 }
0x1dd2   :  { %v3518_v32 = vmul.f32 %v3516_v21, %v3516_v21  ;;  %v3546_v12 = vmul.f32 %v3545_v23, %v3516_v21  ;;  %v3747_v21 = vrot.slane %v5011_v4, %v1910_v15 }
0x1dd3   :  { %v3523_v35 = vsel %vm76_vm0, %v3519_v34, 0.0 }
0x1dd4   :  { %v3520_v33 = vsel %vm76_vm0, %v3518_v32, 0.0 }
0x1dd5   :  { %3521 = vadd.xlane.f32.xlu0 %v3520_v33 }
0x1dd9   :  { %3524 = vadd.xlane.f32.xlu0 %v3523_v35 }
0x1e62   :  { %v3522_v50 = vpop.xlane.xlu0 %3521 }
0x1e63   :  { %v3526_v51 = vmul.f32 0.032258064, %v3522_v50 }
0x1e65   :  { %4480 = vrsqrt.f32 %v3526_v51  ;;  %vm3530_vm5 = vcmp.eq.f32.partialorder %v3526_v51, inf  ;;  %v3533_v60 = vand.u32 2147483648, %v3526_v51  ;;  %vm3532_vm6 = vcmp.eq.f32.partialorder %v3526_v51, 0.0 }
0x1e66   :  { %v3525_v54 = vpop.xlane.xlu0 %3524 }
0x1e67   :  { %v3527_v56 = vmul.f32 0.032258064, %v3525_v54 }
0x1e69   :  { %4482 = vrsqrt.f32 %v3527_v56  ;;  %vm3537_vm8 = vcmp.eq.f32.partialorder %v3527_v56, inf  ;;  %v3540_v1 = vand.u32 2147483648, %v3527_v56  ;;  %vm3539_vm9 = vcmp.eq.f32.partialorder %v3527_v56, 0.0 }
0x1e6f   :  { %v4481_v58 = vpop.eup %4480 }
0x1e70   :  { %v3529_v59 = vmul.f32 %v4481_v58, %v3526_v51 }
0x1e72   :  { %v3531_v2 = vsel %vm3530_vm5, %v3526_v51, %v3529_v59 }
0x1e73   :  { %v4483_v18 = vpop.eup %4482  ;;  %v3534_v5 = vsel %vm3532_vm6, %v3533_v60, %v3531_v2 }
0x1e74   :  { %v3536_v7 = vmul.f32 %v4483_v18, %v3527_v56  ;;  %v3548_v8 = vadd.f32 1e-06, %v3534_v5  ;;  %v3751_v5 = vld [vmem:[#allocation6 + $0x10] sm:$0xff] }
0x1e76   :  { %v3538_v0 = vsel %vm3537_vm8, %v3527_v56, %v3536_v7  ;;  %4484 = vrcp.f32 %v3548_v8  ;;  %v3789_v7 = vrot.slane %v3751_v5, %v4703_v52  ;;  %v3801_v8 = vrot.slane %v3751_v5, %v4902_v53 }
0x1e77   :  { %v3541_v10 = vsel %vm3539_vm9, %v3540_v1, %v3538_v0 }
0x1e78   :  { %v3549_v11 = vadd.f32 1e-06, %v3541_v10 }
0x1e7a   :  { %4486 = vrcp.f32 %v3549_v11 }
0x1e80   :  { %v4485_v14 = vpop.eup %4484 }
0x1e81   :  { %v3551_v37 = vmul.f32 %v4485_v14, %v3546_v12 }
0x1e83   :  { %v3558_v17 = vadd.f32 %v3557_v13, %v3551_v37 }
0x1e84   :  { %v4487_v19 = vpop.eup %4486 }
0x1e85   :  { %v3553_v24 = vmul.f32 %v4487_v19, %v3547_v16  ;;  %4270 = vmatprep.mubr.msk.f32.mxu1 %vm76_vm0, %v3558_v17 }
0x1e87   :  { %v3559_v25 = vadd.f32 %v3557_v13, %v3553_v24 }
0x1e89   :  { %4271 = vmatmul.mubr.msk.f32.vlgmr.msra.gmra.mrb[42].mxu1 %vm76_vm0, %v3559_v25 }
0x1f5c   :  { %v4272_v62 = vpop.f32.mrb[42].mxu1 }
0x1f5d   :  { %v3647_v63 = vadd.f32 %v4272_v62, %v3568_v27  ;;  %v3641_v28 = vpop.f32.mrb[43].mxu1 }
0x1f5e   :  { %v3642_v29 = vadd.f32 %v3641_v28, %v3568_v27 }
0x1f5f   :  { %v3651_v55 = vmax.f32 %v3647_v63, 0.0 }
0x1f60   :  { %v3650_v30 = vmax.f32 %v3642_v29, 0.0 }
0x1f62   :  { %4289 = vmatprep.mubr.msk.f32.mxu0 %vm1824_vm1, %v3650_v30 }
0x1f63   :  { %4290 = vmatmul.mubr.msk.f32.vlgmr.msra.gmra.mrb[34].mxu0 %vm1824_vm1, %v3651_v55 }
0x2036   :  { %v4291_v32 = vpop.f32.mrb[34].mxu0 }
0x2037   :  { %v3743_v33 = vadd.f32 %v4291_v32, %v5209_v39  ;;  %v3733_v34 = vpop.f32.mrb[35].mxu0 }
0x2038   :  { %v3742_v9 = vadd.f32 %v3733_v34, %v5211_v26 }
0x2039   :  { %v3749_v35 = vadd.f32 %v3747_v21, %v3743_v33 }
0x203a   :  { %v3748_v36 = vadd.f32 %v3747_v21, %v3742_v9 }
0x203b   :  { %v3755_v20 = vsel %vm76_vm0, %v3749_v35, 0.0 }
0x203c   :  { %3756 = vadd.xlane.f32.xlu1 %v3755_v20  ;;  %v3752_v3 = vsel %vm76_vm0, %v3748_v36, 0.0 }
0x203d   :  { %3753 = vadd.xlane.f32.xlu0 %v3752_v3 }
0x20c9   :  { %v3757_v57 = vpop.xlane.xlu1 %3756 }
0x20ca   :  { %v3759_v38 = vmul.f32 0.03125, %v3757_v57  ;;  %v3754_v6 = vpop.xlane.xlu0 %3753 }
0x20cb   :  { %v3758_v31 = vmul.f32 0.03125, %v3754_v6 }
0x20cc   :  { %v3761_v40 = vsub.f32 %v3749_v35, %v3759_v38 }
0x20cd   :  { %v3760_v15 = vsub.f32 %v3748_v36, %v3758_v31 }
0x20ce   :  { %v3763_v4 = vmul.f32 %v3761_v40, %v3761_v40  ;;  %v3791_v1 = vmul.f32 %v3789_v7, %v3761_v40 }
0x20cf   :  { %v3762_v43 = vmul.f32 %v3760_v15, %v3760_v15  ;;  %v3790_v10 = vmul.f32 %v3789_v7, %v3760_v15 }
0x20d0   :  { %v3767_v39 = vsel %vm76_vm0, %v3763_v4, 0.0 }
0x20d1   :  { %3768 = vadd.xlane.f32.xlu1 %v3767_v39  ;;  %v3764_v26 = vsel %vm76_vm0, %v3762_v43, 0.0 }
0x20d2   :  { %3765 = vadd.xlane.f32.xlu0 %v3764_v26 }
0x215e   :  { %v3769_v45 = vpop.xlane.xlu1 %3768 }
0x215f   :  { %v3771_v42 = vmul.f32 0.032258064, %v3769_v45  ;;  %v3766_v41 = vpop.xlane.xlu0 %3765 }
0x2160   :  { %v3770_v61 = vmul.f32 0.032258064, %v3766_v41 }
0x2161   :  { %4488 = vrsqrt.f32 %v3771_v42  ;;  %vm3781_vm10 = vcmp.eq.f32.partialorder %v3771_v42, inf  ;;  %v3784_v50 = vand.u32 2147483648, %v3771_v42  ;;  %vm3783_vm11 = vcmp.eq.f32.partialorder %v3771_v42, 0.0 }
0x2162   :  { %4490 = vrsqrt.f32 %v3770_v61  ;;  %vm3774_vm12 = vcmp.eq.f32.partialorder %v3770_v61, inf  ;;  %v3777_v56 = vand.u32 2147483648, %v3770_v61  ;;  %vm3776_vm13 = vcmp.eq.f32.partialorder %v3770_v61, 0.0 }
0x216b   :  { %v4489_v44 = vpop.eup %4488 }
0x216c   :  { %v4491_v47 = vpop.eup %4490  ;;  %v3780_v48 = vmul.f32 %v4489_v44, %v3771_v42 }
0x216d   :  { %v3773_v51 = vmul.f32 %v4491_v47, %v3770_v61 }
0x216e   :  { %v3782_v54 = vsel %vm3781_vm10, %v3771_v42, %v3780_v48 }
0x216f   :  { %v3785_v58 = vsel %vm3783_vm11, %v3784_v50, %v3782_v54  ;;  %v3775_v59 = vsel %vm3774_vm12, %v3770_v61, %v3773_v51 }
0x2170   :  { %v3793_v60 = vadd.f32 1e-06, %v3785_v58  ;;  %v3778_v2 = vsel %vm3776_vm13, %v3777_v56, %v3775_v59 }
0x2171   :  { %v3792_v18 = vadd.f32 1e-06, %v3778_v2 }
0x2172   :  { %4492 = vrcp.f32 %v3793_v60 }
0x2173   :  { %4494 = vrcp.f32 %v3792_v18 }
0x217c   :  { %v4493_v0 = vpop.eup %4492 }
0x217d   :  { %v4495_v11 = vpop.eup %4494  ;;  %v3797_v23 = vmul.f32 %v4493_v0, %v3791_v1 }
0x217e   :  { %v3795_v12 = vmul.f32 %v4495_v11, %v3790_v10 }
0x217f   :  { %v3803_v13 = vadd.f32 %v3801_v8, %v3797_v23 }
0x2180   :  { %v3802_v14 = vadd.f32 %v3801_v8, %v3795_v12 }
0x2181   :  { %3805 = vst.msk [vmem:[#allocation8 + $0x8] sm:$0xff] %vm76_vm0, %v3803_v13 }
0x2182   :  { %3804 = vst.msk [vmem:[#allocation8] sm:$0xff] %vm76_vm0, %v3802_v14 }
0x2183   :  { %4551 = shalt.err (!%p4548_p6)
}
0x2184   :  { %s4552_s22 = scalar_lea.hbm %s5305_s7, 256 }
0x2185   :  { %p4553_p7 = scmp.ne.s32.totalorder %s5305_s7, %s4552_s22  ;;  %p4556_p8 = scmp.lt.u32.totalorder %s4552_s22, %s5305_s7 }
0x2187   :  { %p4558_p9 = pnand %p4556_p8, %p4553_p7 }
0x2189   :  { %4561 = shalt.err (!%p4558_p9)
}
0x218a   :  { %3817 = dma.vmem_to_hbm [thread:$0]  %s3812_s19, 256, %s5305_s7, [#allocation5], %s4569_s11, %s4569_s11, %s4570_s12  }
0x218b   :  { %4566 = dma.done.wait [#allocation5], 256  }
0x218c   :  { %4567 = vsyncadd [#allocation5], 4294967040 }
0x218d   :  { %3821 = vsyncpa [#allocation4], 1 }
0x218e   :  { %3822 = vsyncpa [#allocation7], 1 }
0x218f   :  { %3823 = vsyncpa [#allocation5], 1 }

</bundles_post_ra>
